<compile_context>
chip_gen: v6e
topology: v6e:2x2x1
jax: 0.10.0
libtpu: 0.0.40
codegen_flags: <defaults>
</compile_context>

<pallas_src>
import functools

import jax
import jax.numpy as jnp
from jax.experimental import pallas as pl
from jax.experimental.pallas import tpu as pltpu


def _rgcn_layer_kernel(a_ref, x_ref, o_ref, *, neg_slope):
    """One grid step: o[rows_i] (+)= leaky_relu(A[r, rows_i, :] @ X).

    grid = (row_tiles, num_rel); the relation axis is the inner 'arbitrary'
    reduction axis, so the output block stays resident in VMEM across it.
      a_ref: (tm, N) bf16 row slab of relation r
      x_ref: (N, H)  bf16, fully resident (constant block index)
      o_ref: (tm, H) f32 output / relation-sum accumulator
    """
    r = pl.program_id(1)

    t = jnp.dot(a_ref[...], x_ref[...], preferred_element_type=jnp.float32)
    t = jnp.where(t > 0.0, t, neg_slope * t)   # LeakyReLU per relation (torch default slope)

    @pl.when(r == 0)
    def _():
        o_ref[...] = t

    @pl.when(r != 0)
    def _():
        o_ref[...] += t


def _pick_row_tile(n, vmem_budget_bytes=40 << 20):
    """Largest row tile that divides N, is sublane aligned, keeps >= 2 row tiles
    (so v7x's two TensorCores both get work on the 'parallel' axis) and whose
    double-buffered bf16 A slab fits the VMEM budget. Prefers multiples of 256
    for v6e/v7x MXU fill."""
    for tm in (1024, 768, 512, 384, 256, 128, 64, 32, 16, 8):
        if n % tm:
            continue
        if n // tm < 2:
            continue
        if 2 * tm * n * 2 > vmem_budget_bytes:   # double-buffered bf16 A rows
            continue
        return tm
    return n   # tiny graphs: single row tile covering all rows


def rgcn_layer(adj, embs, *, neg_slope=0.01, row_tile=None):
    """One RelationalGraphConvLayer forward: sum_r leaky_relu(A[r] @ X) -> (N, H) f32."""
    R, N, Nk = adj.shape
    assert N == Nk, "adjacency must be square per relation"
    H = embs.shape[-1]

    # bf16 MXU inputs, f32 accumulation.
    a = adj if adj.dtype == jnp.bfloat16 else adj.astype(jnp.bfloat16)
    x = embs if embs.dtype == jnp.bfloat16 else embs.astype(jnp.bfloat16)

    tm = row_tile or _pick_row_tile(N)
    grid = (N // tm, R)

    # VMEM need: double-buffered A slab + resident X (conservatively x2) + output tile x2.
    need = 2 * tm * N * 2 + 2 * N * H * 2 + 2 * tm * H * 4
    vmem_limit = min(max(need + (8 << 20), 32 << 20), 60 << 20)   # headroom, v7x-safe cap

    cost = pl.CostEstimate(
        flops=2 * R * N * N * H,
        transcendentals=0,
        bytes_accessed=R * N * N * 2 + N * H * 2 + N * H * 4,
    )

    kernel = functools.partial(_rgcn_layer_kernel, neg_slope=neg_slope)

    return pl.pallas_call(
        kernel,
        out_shape=jax.ShapeDtypeStruct((N, H), jnp.float32),
        grid_spec=pltpu.PrefetchScalarGridSpec(
            num_scalar_prefetch=0,
            grid=grid,
            in_specs=[
                # (tm, N) row slab of A[r]; relation dim squeezed away.
                pl.BlockSpec((pl.Squeezed(), tm, N), lambda i, r: (r, i, 0)),
                # X fully resident in VMEM: constant block index -> single DMA.
                pl.BlockSpec((N, H), lambda i, r: (0, 0)),
            ],
            out_specs=pl.BlockSpec((tm, H), lambda i, r: (i, 0)),
        ),
        compiler_params=pltpu.CompilerParams(
            dimension_semantics=("parallel", "arbitrary"),
            vmem_limit_bytes=vmem_limit,
        ),
        cost_estimate=cost,
    )(a, x)


def rgcn_model_forward(adj, init_embs, num_layer, *, neg_slope=0.01,
                       use_residual=False, use_layer_weight=False):
    """RelationalGraphConvModel.forward: stack of rgcn layers. Returns out_embs."""
    adj_bf16 = adj.astype(jnp.bfloat16)   # cast the adjacency once, reuse every layer
    embs = init_embs
    one_embs = None
    embs_list = []
    for i in range(num_layer):
        embs = rgcn_layer(adj_bf16, embs, neg_slope=neg_slope)
        if i == 0 and use_residual:
            one_embs = embs
        if i > 0 and use_residual:
            embs = embs + one_embs
        if use_layer_weight:
            embs_list.append(embs)
    if use_layer_weight:
        return jnp.mean(jnp.stack(embs_list, axis=1), axis=1)
    return embs


def rgcn_model_forward_ref(adj, init_embs, num_layer, *, neg_slope=0.01,
                           bf16_inputs=False):
    """Pure-JAX reference. With bf16_inputs=True it matches the kernel's
    precision (bf16 matmul inputs, f32 accumulation) exactly."""
    a = adj.astype(jnp.bfloat16).astype(jnp.float32) if bf16_inputs else adj
    embs = init_embs
    for _ in range(num_layer):
        x = embs.astype(jnp.bfloat16).astype(jnp.float32) if bf16_inputs else embs
        t = jnp.einsum("rnk,kh->rnh", a, x, precision=jax.lax.Precision.HIGHEST)
        t = jnp.where(t > 0.0, t, neg_slope * t)
        embs = jnp.sum(t, axis=0)
    return embs


if __name__ == "__main__":
    # Small deterministic setup consistent with the module:
    #   rel_dict with 3 relations, hidden_size = 128, num_layer = 2,
    #   dropout = [0, 0], active_fun = 'leaky_relu', use_weight=False, use_rgcn=True.
    N = 512      # number of graph nodes (2 row tiles of 256)
    H = 128      # hidden_size
    R = 3        # len(rel_dict)
    num_layer = 2

    key = jax.random.PRNGKey(0)
    k_adj, k_emb = jax.random.split(key)

    # Dense, row-normalized non-negative adjacency per relation (norm_A analogue).
    adj_raw = jax.random.uniform(k_adj, (R, N, N), dtype=jnp.float32)
    adj = adj_raw / jnp.sum(adj_raw, axis=-1, keepdims=True)

    # init_embs (the nn.Parameter self.all_embs).
    init_embs = jax.random.normal(k_emb, (N, H), dtype=jnp.float32) * 0.1

    fwd = jax.jit(functools.partial(rgcn_model_forward, num_layer=num_layer))
    out = jax.block_until_ready(fwd(adj, init_embs))

    ref_matched = rgcn_model_forward_ref(adj, init_embs, num_layer, bf16_inputs=True)
    ref_f32 = rgcn_model_forward_ref(adj, init_embs, num_layer, bf16_inputs=False)

    assert out.shape == (N, H)
    assert jnp.allclose(out, ref_matched, rtol=1e-2, atol=1e-5), \
        "mismatch vs precision-matched (bf16-input) reference"
    assert jnp.allclose(out, ref_f32, rtol=1e-1, atol=1e-3), \
        "mismatch vs full-f32 reference"

    print("KERNEL_OK")
</pallas_src>

<mosaic_0001>
module attributes {stable_mosaic.version = 11 : i64} {
  func.func @_rgcn_layer_kernel(%arg0: i32, %arg1: i32, %arg2: memref<1x256x512xbf16, #tpu.memory_space<vmem>>, %arg3: memref<512x128xbf16, #tpu.memory_space<vmem>>, %arg4: memref<256x128xf32, #tpu.memory_space<vmem>>) attributes {dimension_semantics = [#tpu.dimension_semantics<parallel>, #tpu.dimension_semantics<arbitrary>], iteration_bounds = array<i64: 2, 3>, scalar_prefetch = 0 : i64, scratch_operands = 0 : i64, tpu.core_type = #tpu.core_type<tc>, window_params = [{transform_indices = @transform_0, window_bounds = array<i64: 1, 256, 512>}, {pipeline_mode = #tpu.pipeline_mode<synchronous>, transform_indices = @transform_1, window_bounds = array<i64: 512, 128>}, {transform_indices = @transform_2, window_bounds = array<i64: 256, 128>}]} {
    %c0 = arith.constant 0 : index
    %c0_0 = arith.constant 0 : index
    %c0_1 = arith.constant 0 : index
    %0 = vector.load %arg2[%c0, %c0_0, %c0_1] : memref<1x256x512xbf16, #tpu.memory_space<vmem>>, vector<1x256x512xbf16>
    %1 = vector.shape_cast %0 : vector<1x256x512xbf16> to vector<256x512xbf16>
    %c0_2 = arith.constant 0 : index
    %c0_3 = arith.constant 0 : index
    %2 = vector.load %arg3[%c0_2, %c0_3] : memref<512x128xbf16, #tpu.memory_space<vmem>>, vector<512x128xbf16>
    %cst = arith.constant dense<0.000000e+00> : vector<256x128xf32>
    %3 = tpu.matmul %1, %2, %cst {dimension_numbers = #tpu.dot_dimension_numbers<[1], [0], [0], [1], [0, 0, 1, 1], [], []>} : vector<256x512xbf16>, vector<512x128xbf16>, vector<256x128xf32> -> vector<256x128xf32>
    %cst_4 = arith.constant 0.000000e+00 : f32
    %4 = vector.broadcast %cst_4 : f32 to vector<256x128xf32>
    %5 = arith.cmpf ogt, %3, %4 : vector<256x128xf32>
    %cst_5 = arith.constant 0.00999999977 : f32
    %6 = vector.broadcast %cst_5 : f32 to vector<256x128xf32>
    %7 = arith.mulf %6, %3 : vector<256x128xf32>
    %8 = arith.select %5, %3, %7 : vector<256x128xi1>, vector<256x128xf32>
    %c0_i32 = arith.constant 0 : i32
    %9 = arith.cmpi eq, %arg1, %c0_i32 : i32
    %10 = arith.extui %9 : i1 to i32
    %c0_i32_6 = arith.constant 0 : i32
    %11 = arith.cmpi ne, %10, %c0_i32_6 : i32
    scf.if %11 {
      %c0_9 = arith.constant 0 : index
      %c0_10 = arith.constant 0 : index
      %15 = vector.load %arg4[%c0_9, %c0_10] : memref<256x128xf32, #tpu.memory_space<vmem>>, vector<256x128xf32>
      tpu.vector_store %arg4[%c0_9, %c0_10], %8 {strides = array<i32>} : memref<256x128xf32, #tpu.memory_space<vmem>>, vector<256x128xf32>,
    } else {
    }
    %c0_i32_7 = arith.constant 0 : i32
    %12 = arith.cmpi ne, %arg1, %c0_i32_7 : i32
    %13 = arith.extui %12 : i1 to i32
    %c0_i32_8 = arith.constant 0 : i32
    %14 = arith.cmpi ne, %13, %c0_i32_8 : i32
    scf.if %14 {
      %c0_9 = arith.constant 0 : index
      %c0_10 = arith.constant 0 : index
      %15 = vector.load %arg4[%c0_9, %c0_10] : memref<256x128xf32, #tpu.memory_space<vmem>>, vector<256x128xf32>
      %16 = arith.addf %15, %8 : vector<256x128xf32>
      %c0_11 = arith.constant 0 : index
      %c0_12 = arith.constant 0 : index
      %17 = vector.load %arg4[%c0_11, %c0_12] : memref<256x128xf32, #tpu.memory_space<vmem>>, vector<256x128xf32>
      tpu.vector_store %arg4[%c0_11, %c0_12], %16 {strides = array<i32>} : memref<256x128xf32, #tpu.memory_space<vmem>>, vector<256x128xf32>,
    } else {
    }
    return
  }
  func.func @transform_0(%arg0: i32, %arg1: i32) -> (i32, i32, i32) {
    %c0_i32 = arith.constant 0 : i32
    %c0_i32_0 = arith.constant 0 : i32
    return %arg1, %arg0, %c0_i32 : i32, i32, i32
  }
  func.func @transform_1(%arg0: i32, %arg1: i32) -> (i32, i32) {
    %c0_i32 = arith.constant 0 : i32
    %c0_i32_0 = arith.constant 0 : i32
    %c0_i32_1 = arith.constant 0 : i32
    return %c0_i32, %c0_i32_0 : i32, i32
  }
  func.func @transform_2(%arg0: i32, %arg1: i32) -> (i32, i32) {
    %c0_i32 = arith.constant 0 : i32
    %c0_i32_0 = arith.constant 0 : i32
    return %arg0, %c0_i32 : i32, i32
  }
}

module attributes {stable_mosaic.version = 11 : i64} {
  func.func @_rgcn_layer_kernel(%arg0: i32, %arg1: i32, %arg2: memref<1x256x512xbf16, #tpu.memory_space<vmem>>, %arg3: memref<512x128xbf16, #tpu.memory_space<vmem>>, %arg4: memref<256x128xf32, #tpu.memory_space<vmem>>) attributes {dimension_semantics = [#tpu.dimension_semantics<parallel>, #tpu.dimension_semantics<arbitrary>], iteration_bounds = array<i64: 2, 3>, scalar_prefetch = 0 : i64, scratch_operands = 0 : i64, tpu.core_type = #tpu.core_type<tc>, window_params = [{transform_indices = @transform_0, window_bounds = array<i64: 1, 256, 512>}, {pipeline_mode = #tpu.pipeline_mode<synchronous>, transform_indices = @transform_1, window_bounds = array<i64: 512, 128>}, {transform_indices = @transform_2, window_bounds = array<i64: 256, 128>}]} {
    %c0 = arith.constant 0 : index
    %c0_0 = arith.constant 0 : index
    %c0_1 = arith.constant 0 : index
    %0 = vector.load %arg2[%c0, %c0_0, %c0_1] : memref<1x256x512xbf16, #tpu.memory_space<vmem>>, vector<1x256x512xbf16>
    %1 = vector.shape_cast %0 : vector<1x256x512xbf16> to vector<256x512xbf16>
    %c0_2 = arith.constant 0 : index
    %c0_3 = arith.constant 0 : index
    %2 = vector.load %arg3[%c0_2, %c0_3] : memref<512x128xbf16, #tpu.memory_space<vmem>>, vector<512x128xbf16>
    %cst = arith.constant dense<0.000000e+00> : vector<256x128xf32>
    %3 = tpu.matmul %1, %2, %cst {dimension_numbers = #tpu.dot_dimension_numbers<[1], [0], [0], [1], [0, 0, 1, 1], [], []>} : vector<256x512xbf16>, vector<512x128xbf16>, vector<256x128xf32> -> vector<256x128xf32>
    %cst_4 = arith.constant 0.000000e+00 : f32
    %4 = vector.broadcast %cst_4 : f32 to vector<256x128xf32>
    %5 = arith.cmpf ogt, %3, %4 : vector<256x128xf32>
    %cst_5 = arith.constant 0.00999999977 : f32
    %6 = vector.broadcast %cst_5 : f32 to vector<256x128xf32>
    %7 = arith.mulf %6, %3 : vector<256x128xf32>
    %8 = arith.select %5, %3, %7 : vector<256x128xi1>, vector<256x128xf32>
    %c0_i32 = arith.constant 0 : i32
    %9 = arith.cmpi eq, %arg1, %c0_i32 : i32
    %10 = arith.extui %9 : i1 to i32
    %c0_i32_6 = arith.constant 0 : i32
    %11 = arith.cmpi ne, %10, %c0_i32_6 : i32
    scf.if %11 {
      %c0_9 = arith.constant 0 : index
      %c0_10 = arith.constant 0 : index
      %15 = vector.load %arg4[%c0_9, %c0_10] : memref<256x128xf32, #tpu.memory_space<vmem>>, vector<256x128xf32>
      tpu.vector_store %arg4[%c0_9, %c0_10], %8 {strides = array<i32>} : memref<256x128xf32, #tpu.memory_space<vmem>>, vector<256x128xf32>,
    } else {
    }
    %c0_i32_7 = arith.constant 0 : i32
    %12 = arith.cmpi ne, %arg1, %c0_i32_7 : i32
    %13 = arith.extui %12 : i1 to i32
    %c0_i32_8 = arith.constant 0 : i32
    %14 = arith.cmpi ne, %13, %c0_i32_8 : i32
    scf.if %14 {
      %c0_9 = arith.constant 0 : index
      %c0_10 = arith.constant 0 : index
      %15 = vector.load %arg4[%c0_9, %c0_10] : memref<256x128xf32, #tpu.memory_space<vmem>>, vector<256x128xf32>
      %16 = arith.addf %15, %8 : vector<256x128xf32>
      %c0_11 = arith.constant 0 : index
      %c0_12 = arith.constant 0 : index
      %17 = vector.load %arg4[%c0_11, %c0_12] : memref<256x128xf32, #tpu.memory_space<vmem>>, vector<256x128xf32>
      tpu.vector_store %arg4[%c0_11, %c0_12], %16 {strides = array<i32>} : memref<256x128xf32, #tpu.memory_space<vmem>>, vector<256x128xf32>,
    } else {
    }
    return
  }
  func.func @transform_0(%arg0: i32, %arg1: i32) -> (i32, i32, i32) {
    %c0_i32 = arith.constant 0 : i32
    %c0_i32_0 = arith.constant 0 : i32
    return %arg1, %arg0, %c0_i32 : i32, i32, i32
  }
  func.func @transform_1(%arg0: i32, %arg1: i32) -> (i32, i32) {
    %c0_i32 = arith.constant 0 : i32
    %c0_i32_0 = arith.constant 0 : i32
    %c0_i32_1 = arith.constant 0 : i32
    return %c0_i32, %c0_i32_0 : i32, i32
  }
  func.func @transform_2(%arg0: i32, %arg1: i32) -> (i32, i32) {
    %c0_i32 = arith.constant 0 : i32
    %c0_i32_0 = arith.constant 0 : i32
    return %arg0, %c0_i32 : i32, i32
  }
}

</mosaic_0001>

<bundles_post_ra>
// kernel: rgcn_model_forward.2
= control target key start
LH: loop header
LB: loop body
LE: loop exit
PB: predicated region body
PF: predicated region fallthrough
CT: control target
= control target key end

     0   :  { %s2006_s9 = smov 0   ;;  %s2008_s10 = smov 0   ;;  %s2455_s0 = inlined_call_operand.vmem [shape: bf16[3,512,512], index: 0, kind: input, shape index: {}]   ;;  %s2456_s1 = inlined_call_operand.vmem [shape: bf16[512,128], index: 1, kind: input, shape index: {}]   ;;  %s2457_s2 = inlined_call_operand.vmem [shape: f32[512,128], index: 2, kind: output, shape index: {}]  }
   0x1   :  { %s2010_s11 = smov 0   ;;  %s2012_s12 = smov 0  }
   0x2   :  { %s2014_s13 = smov 0  }
   0x3 LB: > { %s21_s14 = sadd.s32 1, %s1981_s11  ;;  %s24_s15 = sadd.s32 1, %s1985_s12  ;;  %s1989_s13 = sphi %s2014_s13, %s12_s13   ;;  %s1985_s12 = sphi %s2012_s12, %s2461_s12   ;;  %s1981_s11 = sphi %s2010_s11, %s2460_s11   ;;  %s1977_s10 = sphi %s2008_s10, %s2459_s10   ;;  %s1973_s9 = sphi %s2006_s9, %s2458_s9  }
   0x4   : > { %p22_p0 = scmp.ge.s32.totalorder %s21_s14, 3  ;;  %p1452_p1 = scmp.ge.s32.totalorder %s1989_s13, 1 }
   0x5   : > { %p132_p2 = scmp.lt.s32.totalorder %s1989_s13, 7 }
   0x6   : > { %s2463_s14 = smov (%p22_p0, %s21_s14), 0  ;;  %s2465_s15 = smov (!%p22_p0, %s24_s15), %s1985_s12 }
   0x7   : > { %p133_p3 = pnand %p1452_p1, %p132_p2  ;;  %p26_p4 = scmp.ge.s32.totalorder %s2465_s15, 2 }
   0x8   : > { %s1453_s18 = sshll.u32 (!%p133_p3), %s1977_s10, 5  ;;  %p160_p6 = scmp.lt.s32.totalorder (!%p133_p3), %s1973_s9, 2 }
   0x9   : > { %s2467_s15 = smov (%p26_p4, %s2465_s15), 0  ;;  %136 = sbr.rel (%p133_p3) target bundleno = 417 (0x1a1), region = 28 }
   0xa   : > { %p162_p5 = scmp.lt.s32.totalorder (!%p133_p3), %s1453_s18, 63  ;;  %p1555_p7 = scmp.ne.s32.totalorder (!%p133_p3), %s1973_s9, 0 }
   0xe   : > { %v1823_v0 = vld [vmem:[%s2456_s1 + $0x78] sm:$0xff]   ;;  %v1827_v4 = vld [vmem:[%s2456_s1 + $0x70] sm:$0xff]   ;;  %s2469_s18 = smov (!%p162_p5, %s1453_s18), 63  ;;  %v1831_v8 = vld [vmem:[%s2456_s1 + $0x68] sm:$0xff]  }
   0xf   : > { %v1824_v1 = vld [vmem:[%s2456_s1 + $0xf8] sm:$0xff]   ;;  %1559 = vmatprep.subr.bf16.mxu0 %v1823_v0  ;;  %v1828_v5 = vld [vmem:[%s2456_s1 + $0xf0] sm:$0xff]   ;;  %s1458_s5 = sshll.u32 %s2469_s18, 3  ;;  %v1832_v9 = vld [vmem:[%s2456_s1 + $0xe8] sm:$0xff]   ;;  %s1454_s24 = sshll.u32 %s2469_s18, 2 }
  0x10   : > { %v1825_v2 = vld [vmem:[%s2456_s1 + $0x38] sm:$0xff]   ;;  %1671 = vmatprep.subr.bf16.mxu1 %v1824_v1  ;;  %v1829_v6 = vld [vmem:[%s2456_s1 + $0x30] sm:$0xff]   ;;  %s2071_s16 = scalar_lea.vmem %s2457_s2, %s1458_s5  ;;  %v1833_v10 = vld [vmem:[%s2456_s1 + $0x28] sm:$0xff]  }
  0x11   : > { %v1826_v3 = vld [vmem:[%s2456_s1 + $0xb8] sm:$0xff]   ;;  %1560 = vmatpush3.bf16.msra.mxu0 %v1825_v2  ;;  %v1830_v7 = vld [vmem:[%s2456_s1 + $0xb0] sm:$0xff]   ;;  %v1834_v11 = vld [vmem:[%s2456_s1 + $0xa8] sm:$0xff]   ;;  %s161_s4 = scalar_select %p160_p6, %s1973_s9, 2 }
  0x12   : > { %1672 = vmatpush3.bf16.msra.mxu1 %v1826_v3  ;;  %1561 = vmatprep.subr.bf16.mxu0 %v1827_v4  ;;  %v1835_v12 = vld [vmem:[%s2456_s1 + $0x60] sm:$0xff]   ;;  %v1839_v16 = vld [vmem:[%s2456_s1 + $0x58] sm:$0xff]   ;;  %v1843_v20 = vld [vmem:[%s2456_s1 + $0x50] sm:$0xff]  }
  0x13   : > { %1673 = vmatprep.subr.bf16.mxu1 %v1828_v5  ;;  %v1836_v13 = vld [vmem:[%s2456_s1 + $0xe0] sm:$0xff]   ;;  %v1840_v17 = vld [vmem:[%s2456_s1 + $0xd8] sm:$0xff]   ;;  %s1455_s21 = sshll.u32 %s161_s4, 8  ;;  %v1844_v21 = vld [vmem:[%s2456_s1 + $0xd0] sm:$0xff]  }
  0x14   : > { %v1837_v14 = vld [vmem:[%s2456_s1 + $0x20] sm:$0xff]   ;;  %v1841_v18 = vld [vmem:[%s2456_s1 + $0x18] sm:$0xff]   ;;  %v1845_v22 = vld [vmem:[%s2456_s1 + $0x10] sm:$0xff]   ;;  %s166_s3 = sadd.s32 %s1455_s21, %s1454_s24 }
  0x15   : > { %1562 = vmatpush3.bf16.msra.mxu0 %v1829_v6  ;;  %v1838_v15 = vld [vmem:[%s2456_s1 + $0xa0] sm:$0xff]   ;;  %v1842_v19 = vld [vmem:[%s2456_s1 + $0x98] sm:$0xff]   ;;  %v1846_v23 = vld [vmem:[%s2456_s1 + $0x90] sm:$0xff]   ;;  %s1456_s10 = sshll.u32 %s166_s3, 2 }
  0x16   : > { %1674 = vmatpush3.bf16.msra.mxu1 %v1830_v7  ;;  %1563 = vmatprep.subr.bf16.mxu0 %v1831_v8  ;;  %v1847_v24 = vld [vmem:[%s2456_s1 + $0x48] sm:$0xff]   ;;  %v1851_v28 = vld [vmem:[%s2456_s1 + $0x40] sm:$0xff]   ;;  %s2142_s26 = scalar_lea.vmem %s2455_s0, %s1456_s10 }
  0x17   : > { %1675 = vmatprep.subr.bf16.mxu1 %v1832_v9  ;;  %v1848_v25 = vld [vmem:[%s2456_s1 + $0xc8] sm:$0xff]   ;;  %v1852_v29 = vld [vmem:[%s2456_s1 + $0xc0] sm:$0xff]  }
  0x18   : > { %v1849_v26 = vld [vmem:[%s2456_s1 + $0x8] sm:$0xff]   ;;  %v1853_v30 = vld [vmem:[%s2456_s1] sm:$0xff]  }
  0x19   : > { %1564 = vmatpush3.bf16.msra.mxu0 %v1833_v10  ;;  %v1850_v27 = vld [vmem:[%s2456_s1 + $0x88] sm:$0xff]   ;;  %v1854_v31 = vld [vmem:[%s2456_s1 + $0x80] sm:$0xff]  }
  0x1a   : > { %1676 = vmatpush3.bf16.msra.mxu1 %v1834_v11  ;;  %1565 = vmatprep.subr.bf16.mxu0 %v1835_v12  ;;  %v1855_v32 = vld [vmem:[%s2142_s26] ss:$16 sps:$4 sm:$0xff]   ;;  %v1857_v33 = vld [vmem:[%s2142_s26 + $0x4] ss:$16 sps:$4 sm:$0xff]   ;;  %v1858_v34 = vld [vmem:[%s2142_s26 + $0x8] ss:$16 sps:$4 sm:$0xff]  }
  0x1b   : > { %1677 = vmatprep.subr.bf16.mxu1 %v1836_v13  ;;  %v1860_v35 = vld [vmem:[%s2142_s26 + $0xc] ss:$16 sps:$4 sm:$0xff]   ;;  %849 = vmatprep.mubr.bf16.mxu0 %v1857_v33  ;;  %v1861_v36 = vld [vmem:[%s2142_s26 + $0x24] ss:$16 sps:$4 sm:$0xff]   ;;  %v1865_v38 = vld [vmem:[%s2142_s26 + $0x20] ss:$16 sps:$4 sm:$0xff]  }
  0x1c   : > { %1010 = vmatprep.mubr.bf16.mxu1 %v1860_v35  ;;  %v1863_v37 = vld [vmem:[%s2142_s26 + $0x2c] ss:$16 sps:$4 sm:$0xff]   ;;  %v1866_v39 = vld [vmem:[%s2142_s26 + $0x28] ss:$16 sps:$4 sm:$0xff]   ;;  %v1867_v40 = vld [vmem:[%s2142_s26 + $0x44] ss:$16 sps:$4 sm:$0xff]  }
  0x1d   : > { %1566 = vmatpush3.bf16.msra.mxu0 %v1837_v14  ;;  %v1869_v41 = vld [vmem:[%s2142_s26 + $0x4c] ss:$16 sps:$4 sm:$0xff]   ;;  %v1871_v42 = vld [vmem:[%s2142_s26 + $0x40] ss:$16 sps:$4 sm:$0xff]   ;;  %v1872_v43 = vld [vmem:[%s2142_s26 + $0x48] ss:$16 sps:$4 sm:$0xff]  }
  0x1e   : > { %1678 = vmatpush3.bf16.msra.mxu1 %v1838_v15  ;;  %1567 = vmatprep.subr.bf16.mxu0 %v1839_v16  ;;  %v1873_v44 = vld [vmem:[%s2142_s26 + $0x64] ss:$16 sps:$4 sm:$0xff]   ;;  %v1875_v45 = vld [vmem:[%s2142_s26 + $0x6c] ss:$16 sps:$4 sm:$0xff]   ;;  %v1877_v46 = vld [vmem:[%s2142_s26 + $0x60] ss:$16 sps:$4 sm:$0xff]  }
  0x1f   : > { %1679 = vmatprep.subr.bf16.mxu1 %v1840_v17  ;;  %v1878_v47 = vld [vmem:[%s2142_s26 + $0x68] ss:$16 sps:$4 sm:$0xff]   ;;  %v1879_v48 = vld [vmem:[%s2142_s26 + $0x84] ss:$16 sps:$4 sm:$0xff]   ;;  %v1881_v49 = vld [vmem:[%s2142_s26 + $0x8c] ss:$16 sps:$4 sm:$0xff]  }
  0x20   : > { %v1883_v50 = vld [vmem:[%s2142_s26 + $0x80] ss:$16 sps:$4 sm:$0xff]   ;;  %v1884_v51 = vld [vmem:[%s2142_s26 + $0x88] ss:$16 sps:$4 sm:$0xff]   ;;  %v1885_v52 = vld [vmem:[%s2142_s26 + $0xa4] ss:$16 sps:$4 sm:$0xff]  }
  0x21   : > { %1568 = vmatpush3.bf16.msra.mxu0 %v1841_v18  ;;  %v1887_v53 = vld [vmem:[%s2142_s26 + $0xac] ss:$16 sps:$4 sm:$0xff]   ;;  %v1889_v54 = vld [vmem:[%s2142_s26 + $0xa0] ss:$16 sps:$4 sm:$0xff]   ;;  %v1890_v55 = vld [vmem:[%s2142_s26 + $0xa8] ss:$16 sps:$4 sm:$0xff]  }
  0x22   : > { %1680 = vmatpush3.bf16.msra.mxu1 %v1842_v19  ;;  %1569 = vmatprep.subr.bf16.mxu0 %v1843_v20  ;;  %v1891_v56 = vld [vmem:[%s2142_s26 + $0xc4] ss:$16 sps:$4 sm:$0xff]   ;;  %v1893_v57 = vld [vmem:[%s2142_s26 + $0xcc] ss:$16 sps:$4 sm:$0xff]   ;;  %v1895_v58 = vld [vmem:[%s2142_s26 + $0xc0] ss:$16 sps:$4 sm:$0xff]  }
  0x23   : > { %1681 = vmatprep.subr.bf16.mxu1 %v1844_v21  ;;  %v1896_v59 = vld [vmem:[%s2142_s26 + $0xc8] ss:$16 sps:$4 sm:$0xff]   ;;  %v1897_v60 = vld [vmem:[%s2142_s26 + $0xe4] ss:$16 sps:$4 sm:$0xff]   ;;  %v1899_v61 = vld [vmem:[%s2142_s26 + $0xec] ss:$16 sps:$4 sm:$0xff]  }
  0x24   : > { %v1901_v62 = vld [vmem:[%s2142_s26 + $0xe0] ss:$16 sps:$4 sm:$0xff]   ;;  %v1902_v63 = vld [vmem:[%s2142_s26 + $0xe8] ss:$16 sps:$4 sm:$0xff]   ;;  %v1903_v0 = vld [vmem:[%s2142_s26 + $0x104] ss:$16 sps:$4 sm:$0xff]  }
  0x25   : > { %1570 = vmatpush3.bf16.msra.mxu0 %v1845_v22  ;;  %v1905_v1 = vld [vmem:[%s2142_s26 + $0x10c] ss:$16 sps:$4 sm:$0xff]   ;;  %v1907_v2 = vld [vmem:[%s2142_s26 + $0x100] ss:$16 sps:$4 sm:$0xff]   ;;  %v1908_v3 = vld [vmem:[%s2142_s26 + $0x108] ss:$16 sps:$4 sm:$0xff]  }
  0x26   : > { %1682 = vmatpush3.bf16.msra.mxu1 %v1846_v23  ;;  %1571 = vmatprep.subr.bf16.mxu0 %v1847_v24  ;;  %v1909_v4 = vld [vmem:[%s2142_s26 + $0x124] ss:$16 sps:$4 sm:$0xff]   ;;  %v1911_v5 = vld [vmem:[%s2142_s26 + $0x12c] ss:$16 sps:$4 sm:$0xff]   ;;  %v1913_v6 = vld [vmem:[%s2142_s26 + $0x120] ss:$16 sps:$4 sm:$0xff]  }
  0x27   : > { %1683 = vmatprep.subr.bf16.mxu1 %v1848_v25  ;;  %v1914_v7 = vld [vmem:[%s2142_s26 + $0x128] ss:$16 sps:$4 sm:$0xff]   ;;  %v1915_v8 = vld [vmem:[%s2142_s26 + $0x144] ss:$16 sps:$4 sm:$0xff]   ;;  %v1917_v9 = vld [vmem:[%s2142_s26 + $0x14c] ss:$16 sps:$4 sm:$0xff]  }
  0x28   : > { %v1919_v10 = vld [vmem:[%s2142_s26 + $0x140] ss:$16 sps:$4 sm:$0xff]   ;;  %v1920_v11 = vld [vmem:[%s2142_s26 + $0x148] ss:$16 sps:$4 sm:$0xff]   ;;  %v1921_v12 = vld [vmem:[%s2142_s26 + $0x164] ss:$16 sps:$4 sm:$0xff]  }
  0x29   : > { %1572 = vmatpush3.bf16.msra.mxu0 %v1849_v26  ;;  %v1923_v13 = vld [vmem:[%s2142_s26 + $0x16c] ss:$16 sps:$4 sm:$0xff]   ;;  %v1925_v14 = vld [vmem:[%s2142_s26 + $0x160] ss:$16 sps:$4 sm:$0xff]   ;;  %v1926_v15 = vld [vmem:[%s2142_s26 + $0x168] ss:$16 sps:$4 sm:$0xff]  }
  0x2a   : > { %1684 = vmatpush3.bf16.msra.mxu1 %v1850_v27  ;;  %1573 = vmatprep.subr.bf16.mxu0 %v1851_v28  ;;  %v1927_v16 = vld [vmem:[%s2142_s26 + $0x184] ss:$16 sps:$4 sm:$0xff]   ;;  %v1929_v17 = vld [vmem:[%s2142_s26 + $0x18c] ss:$16 sps:$4 sm:$0xff]   ;;  %v1931_v18 = vld [vmem:[%s2142_s26 + $0x180] ss:$16 sps:$4 sm:$0xff]  }
  0x2b   : > { %1685 = vmatprep.subr.bf16.mxu1 %v1852_v29  ;;  %v1932_v19 = vld [vmem:[%s2142_s26 + $0x188] ss:$16 sps:$4 sm:$0xff]   ;;  %v1933_v20 = vld [vmem:[%s2142_s26 + $0x1a4] ss:$16 sps:$4 sm:$0xff]   ;;  %v1935_v21 = vld [vmem:[%s2142_s26 + $0x1ac] ss:$16 sps:$4 sm:$0xff]  }
  0x2c   : > { %v1937_v22 = vld [vmem:[%s2142_s26 + $0x1a0] ss:$16 sps:$4 sm:$0xff]   ;;  %v1938_v23 = vld [vmem:[%s2142_s26 + $0x1a8] ss:$16 sps:$4 sm:$0xff]   ;;  %v1939_v24 = vld [vmem:[%s2142_s26 + $0x1c4] ss:$16 sps:$4 sm:$0xff]  }
  0x2d   : > { %1574 = vmatpush3.bf16.msra.mxu0 %v1853_v30  ;;  %v1941_v25 = vld [vmem:[%s2142_s26 + $0x1cc] ss:$16 sps:$4 sm:$0xff]   ;;  %v1943_v26 = vld [vmem:[%s2142_s26 + $0x1c0] ss:$16 sps:$4 sm:$0xff]   ;;  %v1944_v27 = vld [vmem:[%s2142_s26 + $0x1c8] ss:$16 sps:$4 sm:$0xff]  }
  0x2e   : > { %1686 = vmatpush3.bf16.msra.mxu1 %v1854_v31  ;;  %v1945_v28 = vld [vmem:[%s2142_s26 + $0x1e4] ss:$16 sps:$4 sm:$0xff]   ;;  %v1947_v29 = vld [vmem:[%s2142_s26 + $0x1ec] ss:$16 sps:$4 sm:$0xff]   ;;  %v1949_v30 = vld [vmem:[%s2142_s26 + $0x1e0] ss:$16 sps:$4 sm:$0xff]  }
  0x2f   : > { %v1950_v31 = vld [vmem:[%s2142_s26 + $0x1e8] ss:$16 sps:$4 sm:$0xff]  }
  0x30   : > { %850 = vmatmul.mubr.bf16.vlgmr.msra.gmra.mxu0 %v1855_v32 }
  0x31   : > { %1011 = vmatmul.mubr.bf16.vlgmr.msra.gmra.mxu1 %v1858_v34  ;;  %857 = vmatprep.mubr.bf16.mxu0 %v1861_v36 }
  0x32   : > { %1018 = vmatprep.mubr.bf16.mxu1 %v1863_v37 }
  0x38   : > { %858 = vmatmul.mubr.bf16.gmra.mxu0 %v1865_v38 }
  0x39   : > { %1019 = vmatmul.mubr.bf16.gmra.mxu1 %v1866_v39  ;;  %865 = vmatprep.mubr.bf16.mxu0 %v1867_v40 }
  0x3a   : > { %1026 = vmatprep.mubr.bf16.mxu1 %v1869_v41 }
  0x40   : > { %866 = vmatmul.mubr.bf16.gmra.mxu0 %v1871_v42 }
  0x41   : > { %1027 = vmatmul.mubr.bf16.gmra.mxu1 %v1872_v43  ;;  %873 = vmatprep.mubr.bf16.mxu0 %v1873_v44 }
  0x42   : > { %1034 = vmatprep.mubr.bf16.mxu1 %v1875_v45 }
  0x48   : > { %874 = vmatmul.mubr.bf16.gmra.mxu0 %v1877_v46 }
  0x49   : > { %1035 = vmatmul.mubr.bf16.gmra.mxu1 %v1878_v47  ;;  %881 = vmatprep.mubr.bf16.mxu0 %v1879_v48 }
  0x4a   : > { %1042 = vmatprep.mubr.bf16.mxu1 %v1881_v49 }
  0x50   : > { %882 = vmatmul.mubr.bf16.gmra.mxu0 %v1883_v50 }
  0x51   : > { %1043 = vmatmul.mubr.bf16.gmra.mxu1 %v1884_v51  ;;  %889 = vmatprep.mubr.bf16.mxu0 %v1885_v52 }
  0x52   : > { %1050 = vmatprep.mubr.bf16.mxu1 %v1887_v53 }
  0x58   : > { %890 = vmatmul.mubr.bf16.gmra.mxu0 %v1889_v54 }
  0x59   : > { %1051 = vmatmul.mubr.bf16.gmra.mxu1 %v1890_v55  ;;  %897 = vmatprep.mubr.bf16.mxu0 %v1891_v56 }
  0x5a   : > { %1058 = vmatprep.mubr.bf16.mxu1 %v1893_v57 }
  0x60   : > { %898 = vmatmul.mubr.bf16.gmra.mxu0 %v1895_v58 }
  0x61   : > { %1059 = vmatmul.mubr.bf16.gmra.mxu1 %v1896_v59  ;;  %905 = vmatprep.mubr.bf16.mxu0 %v1897_v60 }
  0x62   : > { %1066 = vmatprep.mubr.bf16.mxu1 %v1899_v61 }
  0x68   : > { %906 = vmatmul.mubr.bf16.gmra.mxu0 %v1901_v62 }
  0x69   : > { %1067 = vmatmul.mubr.bf16.gmra.mxu1 %v1902_v63  ;;  %913 = vmatprep.mubr.bf16.mxu0 %v1903_v0 }
  0x6a   : > { %1074 = vmatprep.mubr.bf16.mxu1 %v1905_v1 }
  0x70   : > { %914 = vmatmul.mubr.bf16.gmra.mxu0 %v1907_v2 }
  0x71   : > { %1075 = vmatmul.mubr.bf16.gmra.mxu1 %v1908_v3  ;;  %921 = vmatprep.mubr.bf16.mxu0 %v1909_v4 }
  0x72   : > { %1082 = vmatprep.mubr.bf16.mxu1 %v1911_v5 }
  0x78   : > { %922 = vmatmul.mubr.bf16.gmra.mxu0 %v1913_v6 }
  0x79   : > { %1083 = vmatmul.mubr.bf16.gmra.mxu1 %v1914_v7  ;;  %929 = vmatprep.mubr.bf16.mxu0 %v1915_v8 }
  0x7a   : > { %1090 = vmatprep.mubr.bf16.mxu1 %v1917_v9 }
  0x80   : > { %930 = vmatmul.mubr.bf16.gmra.mxu0 %v1919_v10 }
  0x81   : > { %1091 = vmatmul.mubr.bf16.gmra.mxu1 %v1920_v11  ;;  %937 = vmatprep.mubr.bf16.mxu0 %v1921_v12 }
  0x82   : > { %1098 = vmatprep.mubr.bf16.mxu1 %v1923_v13 }
  0x88   : > { %938 = vmatmul.mubr.bf16.gmra.mxu0 %v1925_v14 }
  0x89   : > { %1099 = vmatmul.mubr.bf16.gmra.mxu1 %v1926_v15  ;;  %945 = vmatprep.mubr.bf16.mxu0 %v1927_v16 }
  0x8a   : > { %1106 = vmatprep.mubr.bf16.mxu1 %v1929_v17 }
  0x90   : > { %946 = vmatmul.mubr.bf16.gmra.mxu0 %v1931_v18 }
  0x91   : > { %1107 = vmatmul.mubr.bf16.gmra.mxu1 %v1932_v19  ;;  %953 = vmatprep.mubr.bf16.mxu0 %v1933_v20 }
  0x92   : > { %1114 = vmatprep.mubr.bf16.mxu1 %v1935_v21 }
  0x98   : > { %954 = vmatmul.mubr.bf16.gmra.mxu0 %v1937_v22 }
  0x99   : > { %1115 = vmatmul.mubr.bf16.gmra.mxu1 %v1938_v23  ;;  %961 = vmatprep.mubr.bf16.mxu0 %v1939_v24 }
  0x9a   : > { %1122 = vmatprep.mubr.bf16.mxu1 %v1941_v25 }
  0xa0   : > { %962 = vmatmul.mubr.bf16.gmra.mxu0 %v1943_v26 }
  0xa1   : > { %1123 = vmatmul.mubr.bf16.gmra.mxu1 %v1944_v27  ;;  %969 = vmatprep.mubr.bf16.mxu0 %v1945_v28 }
  0xa2   : > { %1130 = vmatprep.mubr.bf16.mxu1 %v1947_v29 }
  0xa8   : > { %970 = vmatmul.mubr.bf16.gmra.mxu0 %v1949_v30 }
  0xa9   : > { %1131 = vmatmul.mubr.bf16.gmra.mxu1 %v1950_v31 }
  0xf0   : > { %v1575_v32 = vpop.f32.mrf.mxu0 }
  0xf1   : > { %v1687_v33 = vpop.f32.mrf.mxu1 }
  0xf2   : > { %v1576_v34 = vpop.f32.mrf.mxu0 }
  0xf3   : > { %v1577_v35 = vadd.f32 %v1576_v34, %v1575_v32  ;;  %v1688_v36 = vpop.f32.mrf.mxu1 }
  0xf4   : > { %v1689_v37 = vadd.f32 %v1688_v36, %v1687_v33  ;;  %v1578_v38 = vpop.f32.mrf.mxu0 }
  0xf5   : > { %v1690_v39 = vpop.f32.mrf.mxu1 }
  0xf6   : > { %v1013_v40 = vadd.f32 %v1689_v37, %v1577_v35  ;;  %v1579_v41 = vpop.f32.mrf.mxu0 }
  0xf7   : > { %v1580_v42 = vadd.f32 %v1579_v41, %v1578_v38  ;;  %v1691_v43 = vpop.f32.mrf.mxu1 }
  0xf8   : > { %vm1139_vm0 = vcmp.gt.f32.partialorder %v1013_v40, 0.0  ;;  %v1171_v44 = vmul.f32 0.01, %v1013_v40  ;;  %v1692_v45 = vadd.f32 %v1691_v43, %v1690_v39  ;;  %v1581_v46 = vpop.f32.mrf.mxu0 }
  0xf9   : > { %v1693_v47 = vpop.f32.mrf.mxu1 }
  0xfa   : > { %v2214_v48 = vsel %vm1139_vm0, %v1013_v40, %v1171_v44  ;;  %v1016_v49 = vadd.f32 %v1692_v45, %v1580_v42  ;;  %v1582_v50 = vpop.f32.mrf.mxu0 }
  0xfb   : > { %v1583_v51 = vadd.f32 %v1582_v50, %v1581_v46  ;;  %v1694_v52 = vpop.f32.mrf.mxu1 }
  0xfc   : > { %vm1140_vm1 = vcmp.gt.f32.partialorder %v1016_v49, 0.0  ;;  %v1172_v53 = vmul.f32 0.01, %v1016_v49  ;;  %v1695_v54 = vadd.f32 %v1694_v52, %v1693_v47  ;;  %v1584_v55 = vpop.f32.mrf.mxu0 }
  0xfd   : > { %v1696_v56 = vpop.f32.mrf.mxu1 }
  0xfe   : > { %v2216_v57 = vsel %vm1140_vm1, %v1016_v49, %v1172_v53  ;;  %v1021_v58 = vadd.f32 %v1695_v54, %v1583_v51  ;;  %v1585_v59 = vpop.f32.mrf.mxu0 }
  0xff   : > { %v1586_v60 = vadd.f32 %v1585_v59, %v1584_v55  ;;  %v1697_v61 = vpop.f32.mrf.mxu1 }
 0x100   : > { %vm1141_vm2 = vcmp.gt.f32.partialorder %v1021_v58, 0.0  ;;  %v1173_v62 = vmul.f32 0.01, %v1021_v58  ;;  %v1698_v63 = vadd.f32 %v1697_v61, %v1696_v56  ;;  %v1587_v0 = vpop.f32.mrf.mxu0 }
 0x101   : > { %v1699_v1 = vpop.f32.mrf.mxu1 }
 0x102   : > { %v2218_v2 = vsel %vm1141_vm2, %v1021_v58, %v1173_v62  ;;  %v1024_v3 = vadd.f32 %v1698_v63, %v1586_v60  ;;  %v1588_v4 = vpop.f32.mrf.mxu0 }
 0x103   : > { %v1589_v5 = vadd.f32 %v1588_v4, %v1587_v0  ;;  %v1700_v6 = vpop.f32.mrf.mxu1 }
 0x104   : > { %vm1142_vm3 = vcmp.gt.f32.partialorder %v1024_v3, 0.0  ;;  %v1174_v7 = vmul.f32 0.01, %v1024_v3  ;;  %v1701_v8 = vadd.f32 %v1700_v6, %v1699_v1  ;;  %v1590_v9 = vpop.f32.mrf.mxu0 }
 0x105   : > { %v1702_v10 = vpop.f32.mrf.mxu1 }
 0x106   : > { %v2220_v11 = vsel %vm1142_vm3, %v1024_v3, %v1174_v7  ;;  %v1029_v12 = vadd.f32 %v1701_v8, %v1589_v5  ;;  %v1591_v13 = vpop.f32.mrf.mxu0 }
 0x107   : > { %v1592_v14 = vadd.f32 %v1591_v13, %v1590_v9  ;;  %v1703_v15 = vpop.f32.mrf.mxu1 }
 0x108   : > { %vm1143_vm4 = vcmp.gt.f32.partialorder %v1029_v12, 0.0  ;;  %v1175_v16 = vmul.f32 0.01, %v1029_v12  ;;  %v1704_v17 = vadd.f32 %v1703_v15, %v1702_v10  ;;  %v1593_v18 = vpop.f32.mrf.mxu0 }
 0x109   : > { %v1705_v19 = vpop.f32.mrf.mxu1 }
 0x10a   : > { %v2222_v20 = vsel %vm1143_vm4, %v1029_v12, %v1175_v16  ;;  %v1032_v21 = vadd.f32 %v1704_v17, %v1592_v14  ;;  %v1594_v22 = vpop.f32.mrf.mxu0 }
 0x10b   : > { %v1595_v23 = vadd.f32 %v1594_v22, %v1593_v18  ;;  %v1706_v24 = vpop.f32.mrf.mxu1 }
 0x10c   : > { %vm1144_vm5 = vcmp.gt.f32.partialorder %v1032_v21, 0.0  ;;  %v1176_v25 = vmul.f32 0.01, %v1032_v21  ;;  %v1707_v26 = vadd.f32 %v1706_v24, %v1705_v19  ;;  %v1596_v27 = vpop.f32.mrf.mxu0 }
 0x10d   : > { %v1708_v28 = vpop.f32.mrf.mxu1 }
 0x10e   : > { %v2224_v29 = vsel %vm1144_vm5, %v1032_v21, %v1176_v25  ;;  %v1037_v30 = vadd.f32 %v1707_v26, %v1595_v23  ;;  %v1597_v31 = vpop.f32.mrf.mxu0 }
 0x10f   : > { %v1598_v32 = vadd.f32 %v1597_v31, %v1596_v27  ;;  %v1709_v33 = vpop.f32.mrf.mxu1 }
 0x110   : > { %vm1145_vm6 = vcmp.gt.f32.partialorder %v1037_v30, 0.0  ;;  %v1177_v34 = vmul.f32 0.01, %v1037_v30  ;;  %v1710_v35 = vadd.f32 %v1709_v33, %v1708_v28  ;;  %v1599_v36 = vpop.f32.mrf.mxu0 }
 0x111   : > { %v1711_v37 = vpop.f32.mrf.mxu1 }
 0x112   : > { %v2226_v38 = vsel %vm1145_vm6, %v1037_v30, %v1177_v34  ;;  %v1040_v39 = vadd.f32 %v1710_v35, %v1598_v32  ;;  %v1600_v40 = vpop.f32.mrf.mxu0 }
 0x113   : > { %v1601_v41 = vadd.f32 %v1600_v40, %v1599_v36  ;;  %v1712_v42 = vpop.f32.mrf.mxu1 }
 0x114   : > { %vm1146_vm7 = vcmp.gt.f32.partialorder %v1040_v39, 0.0  ;;  %v1178_v43 = vmul.f32 0.01, %v1040_v39  ;;  %v1713_v44 = vadd.f32 %v1712_v42, %v1711_v37  ;;  %v1602_v45 = vpop.f32.mrf.mxu0 }
 0x115   : > { %v1714_v46 = vpop.f32.mrf.mxu1 }
 0x116   : > { %v2228_v47 = vsel %vm1146_vm7, %v1040_v39, %v1178_v43  ;;  %v1045_v49 = vadd.f32 %v1713_v44, %v1601_v41  ;;  %v1603_v50 = vpop.f32.mrf.mxu0 }
 0x117   : > { %v1604_v51 = vadd.f32 %v1603_v50, %v1602_v45  ;;  %v1715_v52 = vpop.f32.mrf.mxu1 }
 0x118   : > { %vm1147_vm8 = vcmp.gt.f32.partialorder %v1045_v49, 0.0  ;;  %v1179_v53 = vmul.f32 0.01, %v1045_v49  ;;  %v1716_v54 = vadd.f32 %v1715_v52, %v1714_v46  ;;  %v1605_v55 = vpop.f32.mrf.mxu0 }
 0x119   : > { %v1717_v56 = vpop.f32.mrf.mxu1 }
 0x11a   : > { %v2230_v58 = vsel %vm1147_vm8, %v1045_v49, %v1179_v53  ;;  %v1048_v59 = vadd.f32 %v1716_v54, %v1604_v51  ;;  %v1606_v60 = vpop.f32.mrf.mxu0 }
 0x11b   : > { %v1607_v61 = vadd.f32 %v1606_v60, %v1605_v55  ;;  %v1718_v62 = vpop.f32.mrf.mxu1 }
 0x11c   : > { %vm1148_vm9 = vcmp.gt.f32.partialorder %v1048_v59, 0.0  ;;  %v1180_v63 = vmul.f32 0.01, %v1048_v59  ;;  %v1719_v0 = vadd.f32 %v1718_v62, %v1717_v56  ;;  %v1608_v1 = vpop.f32.mrf.mxu0 }
 0x11d   : > { %v1720_v3 = vpop.f32.mrf.mxu1 }
 0x11e   : > { %v2232_v4 = vsel %vm1148_vm9, %v1048_v59, %v1180_v63  ;;  %v1053_v5 = vadd.f32 %v1719_v0, %v1607_v61  ;;  %v1609_v6 = vpop.f32.mrf.mxu0 }
 0x11f   : > { %v1610_v7 = vadd.f32 %v1609_v6, %v1608_v1  ;;  %v1721_v8 = vpop.f32.mrf.mxu1 }
 0x120   : > { %vm1149_vm10 = vcmp.gt.f32.partialorder %v1053_v5, 0.0  ;;  %v1181_v9 = vmul.f32 0.01, %v1053_v5  ;;  %v1722_v10 = vadd.f32 %v1721_v8, %v1720_v3  ;;  %v1611_v12 = vpop.f32.mrf.mxu0 }
 0x121   : > { %v1723_v13 = vpop.f32.mrf.mxu1 }
 0x122   : > { %v2234_v14 = vsel %vm1149_vm10, %v1053_v5, %v1181_v9  ;;  %v1056_v15 = vadd.f32 %v1722_v10, %v1610_v7  ;;  %v1612_v16 = vpop.f32.mrf.mxu0 }
 0x123   : > { %v1613_v17 = vadd.f32 %v1612_v16, %v1611_v12  ;;  %v1724_v18 = vpop.f32.mrf.mxu1 }
 0x124   : > { %vm1150_vm11 = vcmp.gt.f32.partialorder %v1056_v15, 0.0  ;;  %v1182_v19 = vmul.f32 0.01, %v1056_v15  ;;  %v1725_v21 = vadd.f32 %v1724_v18, %v1723_v13  ;;  %v1614_v22 = vpop.f32.mrf.mxu0 }
 0x125   : > { %v1726_v23 = vpop.f32.mrf.mxu1 }
 0x126   : > { %v2236_v24 = vsel %vm1150_vm11, %v1056_v15, %v1182_v19  ;;  %v1061_v25 = vadd.f32 %v1725_v21, %v1613_v17  ;;  %v1615_v26 = vpop.f32.mrf.mxu0 }
 0x127   : > { %v1616_v27 = vadd.f32 %v1615_v26, %v1614_v22  ;;  %v1727_v28 = vpop.f32.mrf.mxu1 }
 0x128   : > { %vm1151_vm12 = vcmp.gt.f32.partialorder %v1061_v25, 0.0  ;;  %v1183_v30 = vmul.f32 0.01, %v1061_v25  ;;  %v1728_v31 = vadd.f32 %v1727_v28, %v1726_v23  ;;  %v1617_v32 = vpop.f32.mrf.mxu0 }
 0x129   : > { %v1729_v33 = vpop.f32.mrf.mxu1 }
 0x12a   : > { %v2238_v34 = vsel %vm1151_vm12, %v1061_v25, %v1183_v30  ;;  %v1064_v35 = vadd.f32 %v1728_v31, %v1616_v27  ;;  %v1618_v36 = vpop.f32.mrf.mxu0 }
 0x12b   : > { %v1619_v37 = vadd.f32 %v1618_v36, %v1617_v32  ;;  %v1730_v39 = vpop.f32.mrf.mxu1 }
 0x12c   : > { %vm1152_vm13 = vcmp.gt.f32.partialorder %v1064_v35, 0.0  ;;  %v1184_v40 = vmul.f32 0.01, %v1064_v35  ;;  %v1731_v41 = vadd.f32 %v1730_v39, %v1729_v33  ;;  %v1620_v42 = vpop.f32.mrf.mxu0 }
 0x12d   : > { %v1732_v43 = vpop.f32.mrf.mxu1 }
 0x12e   : > { %v2240_v44 = vsel %vm1152_vm13, %v1064_v35, %v1184_v40  ;;  %v1069_v45 = vadd.f32 %v1731_v41, %v1619_v37  ;;  %v1621_v46 = vpop.f32.mrf.mxu0 }
 0x12f   : > { %v1622_v49 = vadd.f32 %v1621_v46, %v1620_v42  ;;  %v1733_v50 = vpop.f32.mrf.mxu1 }
 0x130   : > { %vm1153_vm14 = vcmp.gt.f32.partialorder %v1069_v45, 0.0  ;;  %v1185_v51 = vmul.f32 0.01, %v1069_v45  ;;  %v1734_v52 = vadd.f32 %v1733_v50, %v1732_v43  ;;  %v1623_v53 = vpop.f32.mrf.mxu0 }
 0x131   : > { %v1735_v54 = vpop.f32.mrf.mxu1 }
 0x132   : > { %v2242_v55 = vsel %vm1153_vm14, %v1069_v45, %v1185_v51  ;;  %v1072_v56 = vadd.f32 %v1734_v52, %v1622_v49  ;;  %v1624_v59 = vpop.f32.mrf.mxu0 }
 0x133   : > { %v1625_v60 = vadd.f32 %v1624_v59, %v1623_v53  ;;  %v1736_v61 = vpop.f32.mrf.mxu1 }
 0x134   : > { %vm1154_vm15 = vcmp.gt.f32.partialorder %v1072_v56, 0.0  ;;  %v1186_v62 = vmul.f32 0.01, %v1072_v56  ;;  %v1737_v63 = vadd.f32 %v1736_v61, %v1735_v54  ;;  %v1626_v0 = vpop.f32.mrf.mxu0 }
 0x135   : > { %v1738_v1 = vpop.f32.mrf.mxu1 }
 0x136   : > { %v2244_v3 = vsel %vm1154_vm15, %v1072_v56, %v1186_v62  ;;  %v1077_v5 = vadd.f32 %v1737_v63, %v1625_v60  ;;  %v1627_v6 = vpop.f32.mrf.mxu0 }
 0x137   : > { %v1628_v7 = vadd.f32 %v1627_v6, %v1626_v0  ;;  %v1739_v8 = vpop.f32.mrf.mxu1 }
 0x138   : > { %vm1155_vm0 = vcmp.gt.f32.partialorder %v1077_v5, 0.0  ;;  %v1187_v9 = vmul.f32 0.01, %v1077_v5  ;;  %v1740_v10 = vadd.f32 %v1739_v8, %v1738_v1  ;;  %v1629_v12 = vpop.f32.mrf.mxu0 }
 0x139   : > { %v1741_v13 = vpop.f32.mrf.mxu1 }
 0x13a   : > { %v2246_v15 = vsel %vm1155_vm0, %v1077_v5, %v1187_v9  ;;  %v1080_v16 = vadd.f32 %v1740_v10, %v1628_v7  ;;  %v1630_v17 = vpop.f32.mrf.mxu0 }
 0x13b   : > { %v1631_v18 = vadd.f32 %v1630_v17, %v1629_v12  ;;  %v1742_v19 = vpop.f32.mrf.mxu1 }
 0x13c   : > { %vm1156_vm1 = vcmp.gt.f32.partialorder %v1080_v16, 0.0  ;;  %v1188_v21 = vmul.f32 0.01, %v1080_v16  ;;  %v1743_v22 = vadd.f32 %v1742_v19, %v1741_v13  ;;  %v1632_v23 = vpop.f32.mrf.mxu0 }
 0x13d   : > { %v1744_v25 = vpop.f32.mrf.mxu1 }
 0x13e   : > { %v2248_v26 = vsel %vm1156_vm1, %v1080_v16, %v1188_v21  ;;  %v1085_v27 = vadd.f32 %v1743_v22, %v1631_v18  ;;  %v1633_v28 = vpop.f32.mrf.mxu0 }
 0x13f   : > { %v1634_v30 = vadd.f32 %v1633_v28, %v1632_v23  ;;  %v1745_v31 = vpop.f32.mrf.mxu1 }
 0x140   : > { %vm1157_vm2 = vcmp.gt.f32.partialorder %v1085_v27, 0.0  ;;  %v1189_v32 = vmul.f32 0.01, %v1085_v27  ;;  %v1746_v33 = vadd.f32 %v1745_v31, %v1744_v25  ;;  %v1635_v35 = vpop.f32.mrf.mxu0 }
 0x141   : > { %v1747_v36 = vpop.f32.mrf.mxu1 }
 0x142   : > { %v2250_v37 = vsel %vm1157_vm2, %v1085_v27, %v1189_v32  ;;  %v1088_v39 = vadd.f32 %v1746_v33, %v1634_v30  ;;  %v1636_v40 = vpop.f32.mrf.mxu0 }
 0x143   : > { %v1637_v41 = vadd.f32 %v1636_v40, %v1635_v35  ;;  %v1748_v42 = vpop.f32.mrf.mxu1 }
 0x144   : > { %vm1158_vm3 = vcmp.gt.f32.partialorder %v1088_v39, 0.0  ;;  %v1190_v43 = vmul.f32 0.01, %v1088_v39  ;;  %v1749_v45 = vadd.f32 %v1748_v42, %v1747_v36  ;;  %v1638_v46 = vpop.f32.mrf.mxu0 }
 0x145   : > { %v1750_v49 = vpop.f32.mrf.mxu1 }
 0x146   : > { %v2252_v50 = vsel %vm1158_vm3, %v1088_v39, %v1190_v43  ;;  %v1093_v51 = vadd.f32 %v1749_v45, %v1637_v41  ;;  %v1639_v52 = vpop.f32.mrf.mxu0 }
 0x147   : > { %v1640_v53 = vadd.f32 %v1639_v52, %v1638_v46  ;;  %v1751_v54 = vpop.f32.mrf.mxu1 }
 0x148   : > { %vm1159_vm4 = vcmp.gt.f32.partialorder %v1093_v51, 0.0  ;;  %v1191_v56 = vmul.f32 0.01, %v1093_v51  ;;  %v1752_v59 = vadd.f32 %v1751_v54, %v1750_v49  ;;  %v1641_v60 = vpop.f32.mrf.mxu0 }
 0x149   : > { %v1753_v61 = vpop.f32.mrf.mxu1 }
 0x14a   : > { %v2254_v62 = vsel %vm1159_vm4, %v1093_v51, %v1191_v56  ;;  %v1096_v63 = vadd.f32 %v1752_v59, %v1640_v53  ;;  %v1642_v0 = vpop.f32.mrf.mxu0 }
 0x14b   : > { %v1643_v1 = vadd.f32 %v1642_v0, %v1641_v60  ;;  %v1754_v5 = vpop.f32.mrf.mxu1 }
 0x14c   : > { %vm1160_vm5 = vcmp.gt.f32.partialorder %v1096_v63, 0.0  ;;  %v1192_v6 = vmul.f32 0.01, %v1096_v63  ;;  %v1755_v7 = vadd.f32 %v1754_v5, %v1753_v61  ;;  %v1644_v8 = vpop.f32.mrf.mxu0 }
 0x14d   : > { %v1756_v9 = vpop.f32.mrf.mxu1 }
 0x14e   : > { %v2256_v10 = vsel %vm1160_vm5, %v1096_v63, %v1192_v6  ;;  %v1101_v12 = vadd.f32 %v1755_v7, %v1643_v1  ;;  %v1645_v13 = vpop.f32.mrf.mxu0 }
 0x14f   : > { %v1646_v16 = vadd.f32 %v1645_v13, %v1644_v8  ;;  %v1757_v17 = vpop.f32.mrf.mxu1 }
 0x150   : > { %vm1161_vm6 = vcmp.gt.f32.partialorder %v1101_v12, 0.0  ;;  %v1193_v18 = vmul.f32 0.01, %v1101_v12  ;;  %v1758_v19 = vadd.f32 %v1757_v17, %v1756_v9  ;;  %v1647_v21 = vpop.f32.mrf.mxu0 }
 0x151   : > { %v1759_v22 = vpop.f32.mrf.mxu1 }
 0x152   : > { %v2258_v23 = vsel %vm1161_vm6, %v1101_v12, %v1193_v18  ;;  %v1104_v25 = vadd.f32 %v1758_v19, %v1646_v16  ;;  %v1648_v27 = vpop.f32.mrf.mxu0 }
 0x153   : > { %v1649_v28 = vadd.f32 %v1648_v27, %v1647_v21  ;;  %v1760_v30 = vpop.f32.mrf.mxu1 }
 0x154   : > { %vm1162_vm7 = vcmp.gt.f32.partialorder %v1104_v25, 0.0  ;;  %v1194_v31 = vmul.f32 0.01, %v1104_v25  ;;  %v1761_v32 = vadd.f32 %v1760_v30, %v1759_v22  ;;  %v1650_v33 = vpop.f32.mrf.mxu0 }
 0x155   : > { %v1762_v35 = vpop.f32.mrf.mxu1 }
 0x156   : > { %v2260_v36 = vsel %vm1162_vm7, %v1104_v25, %v1194_v31  ;;  %v1109_v39 = vadd.f32 %v1761_v32, %v1649_v28  ;;  %v1651_v40 = vpop.f32.mrf.mxu0 }
 0x157   : > { %v1652_v41 = vadd.f32 %v1651_v40, %v1650_v33  ;;  %v1763_v42 = vpop.f32.mrf.mxu1 }
 0x158   : > { %vm1163_vm8 = vcmp.gt.f32.partialorder %v1109_v39, 0.0  ;;  %v1195_v43 = vmul.f32 0.01, %v1109_v39  ;;  %v1764_v45 = vadd.f32 %v1763_v42, %v1762_v35  ;;  %v1653_v46 = vpop.f32.mrf.mxu0 }
 0x159   : > { %v1765_v49 = vpop.f32.mrf.mxu1 }
 0x15a   : > { %v2262_v51 = vsel %vm1163_vm8, %v1109_v39, %v1195_v43  ;;  %v1112_v52 = vadd.f32 %v1764_v45, %v1652_v41  ;;  %v1654_v53 = vpop.f32.mrf.mxu0 }
 0x15b   : > { %v1655_v54 = vadd.f32 %v1654_v53, %v1653_v46  ;;  %v1766_v56 = vpop.f32.mrf.mxu1 }
 0x15c   : > { %vm1164_vm9 = vcmp.gt.f32.partialorder %v1112_v52, 0.0  ;;  %v1196_v59 = vmul.f32 0.01, %v1112_v52  ;;  %v1767_v60 = vadd.f32 %v1766_v56, %v1765_v49  ;;  %v1656_v61 = vpop.f32.mrf.mxu0 }
 0x15d   : > { %v1768_v63 = vpop.f32.mrf.mxu1 }
 0x15e   : > { %v2264_v0 = vsel %vm1164_vm9, %v1112_v52, %v1196_v59  ;;  %v1117_v1 = vadd.f32 %v1767_v60, %v1655_v54  ;;  %v1657_v5 = vpop.f32.mrf.mxu0 }
 0x15f   : > { %v1658_v6 = vadd.f32 %v1657_v5, %v1656_v61  ;;  %v1769_v7 = vpop.f32.mrf.mxu1 }
 0x160   : > { %vm1165_vm10 = vcmp.gt.f32.partialorder %v1117_v1, 0.0  ;;  %v1197_v8 = vmul.f32 0.01, %v1117_v1  ;;  %v1770_v9 = vadd.f32 %v1769_v7, %v1768_v63  ;;  %v1659_v12 = vpop.f32.mrf.mxu0 }
 0x161   : > { %v1771_v13 = vpop.f32.mrf.mxu1 }
 0x162   : > { %v2266_v16 = vsel %vm1165_vm10, %v1117_v1, %v1197_v8  ;;  %v1120_v17 = vadd.f32 %v1770_v9, %v1658_v6  ;;  %v1660_v18 = vpop.f32.mrf.mxu0 }
 0x163   : > { %v1661_v19 = vadd.f32 %v1660_v18, %v1659_v12  ;;  %v1772_v21 = vpop.f32.mrf.mxu1 }
 0x164   : > { %vm1166_vm11 = vcmp.gt.f32.partialorder %v1120_v17, 0.0  ;;  %v1198_v22 = vmul.f32 0.01, %v1120_v17  ;;  %v1773_v25 = vadd.f32 %v1772_v21, %v1771_v13  ;;  %v1662_v27 = vpop.f32.mrf.mxu0 }
 0x165   : > { %v1774_v28 = vpop.f32.mrf.mxu1 }
 0x166   : > { %v2268_v30 = vsel %vm1166_vm11, %v1120_v17, %v1198_v22  ;;  %v1125_v31 = vadd.f32 %v1773_v25, %v1661_v19  ;;  %v1663_v32 = vpop.f32.mrf.mxu0 }
 0x167   : > { %v1664_v33 = vadd.f32 %v1663_v32, %v1662_v27  ;;  %v1775_v35 = vpop.f32.mrf.mxu1 }
 0x168   : > { %vm1167_vm12 = vcmp.gt.f32.partialorder %v1125_v31, 0.0  ;;  %v1199_v39 = vmul.f32 0.01, %v1125_v31  ;;  %v1776_v40 = vadd.f32 %v1775_v35, %v1774_v28  ;;  %v1665_v41 = vpop.f32.mrf.mxu0 }
 0x169   : > { %v1777_v42 = vpop.f32.mrf.mxu1 }
 0x16a   : > { %v2270_v43 = vsel %vm1167_vm12, %v1125_v31, %v1199_v39  ;;  %v1128_v45 = vadd.f32 %v1776_v40, %v1664_v33  ;;  %v1666_v46 = vpop.f32.mrf.mxu0 }
 0x16b   : > { %v1667_v49 = vadd.f32 %v1666_v46, %v1665_v41  ;;  %v1778_v52 = vpop.f32.mrf.mxu1 }
 0x16c   : > { %vm1168_vm13 = vcmp.gt.f32.partialorder %v1128_v45, 0.0  ;;  %v1200_v53 = vmul.f32 0.01, %v1128_v45  ;;  %v1779_v54 = vadd.f32 %v1778_v52, %v1777_v42  ;;  %v1668_v56 = vpop.f32.mrf.mxu0 }
 0x16d   : > { %v1780_v59 = vpop.f32.mrf.mxu1 }
 0x16e   : > { %v2272_v60 = vsel %vm1168_vm13, %v1128_v45, %v1200_v53  ;;  %v1133_v61 = vadd.f32 %v1779_v54, %v1667_v49  ;;  %v1669_v63 = vpop.f32.mrf.mxu0 }
 0x16f   : > { %v1670_v1 = vadd.f32 %v1669_v63, %v1668_v56  ;;  %v1781_v5 = vpop.f32.mrf.mxu1 }
 0x170   : > { %vm1169_vm14 = vcmp.gt.f32.partialorder %v1133_v61, 0.0  ;;  %v1201_v6 = vmul.f32 0.01, %v1133_v61  ;;  %v1782_v7 = vadd.f32 %v1781_v5, %v1780_v59 }
 0x172   : > { %v2274_v8 = vsel %vm1169_vm14, %v1133_v61, %v1201_v6  ;;  %v1136_v9 = vadd.f32 %v1782_v7, %v1670_v1  ;;  %1238 = sbr.rel (%p1555_p7) target bundleno = 391 (0x187), region = 32 }
 0x174   : > { %vm1170_vm15 = vcmp.gt.f32.partialorder %v1136_v9, 0.0  ;;  %v1202_v12 = vmul.f32 0.01, %v1136_v9 }
 0x176   : > { %v2276_v13 = vsel %vm1170_vm15, %v1136_v9, %v1202_v12 }
 0x177   : > { %1239 = vst [vmem:[%s2071_s16] sm:$0xff] %v2214_v48  ;;  %1240 = vst [vmem:[%s2071_s16 + $0x8] sm:$0xff] %v2216_v57 }
 0x178   : > { %1241 = vst [vmem:[%s2071_s16 + $0x10] sm:$0xff] %v2218_v2  ;;  %1242 = vst [vmem:[%s2071_s16 + $0x18] sm:$0xff] %v2220_v11 }
 0x179   : > { %1243 = vst [vmem:[%s2071_s16 + $0x20] sm:$0xff] %v2222_v20  ;;  %1244 = vst [vmem:[%s2071_s16 + $0x28] sm:$0xff] %v2224_v29 }
 0x17a   : > { %1245 = vst [vmem:[%s2071_s16 + $0x30] sm:$0xff] %v2226_v38  ;;  %1246 = vst [vmem:[%s2071_s16 + $0x38] sm:$0xff] %v2228_v47 }
 0x17b   : > { %1247 = vst [vmem:[%s2071_s16 + $0x40] sm:$0xff] %v2230_v58  ;;  %1248 = vst [vmem:[%s2071_s16 + $0x48] sm:$0xff] %v2232_v4 }
 0x17c   : > { %1249 = vst [vmem:[%s2071_s16 + $0x50] sm:$0xff] %v2234_v14  ;;  %1250 = vst [vmem:[%s2071_s16 + $0x58] sm:$0xff] %v2236_v24 }
 0x17d   : > { %1251 = vst [vmem:[%s2071_s16 + $0x60] sm:$0xff] %v2238_v34  ;;  %1252 = vst [vmem:[%s2071_s16 + $0x68] sm:$0xff] %v2240_v44 }
 0x17e   : > { %1253 = vst [vmem:[%s2071_s16 + $0x70] sm:$0xff] %v2242_v55  ;;  %1254 = vst [vmem:[%s2071_s16 + $0x78] sm:$0xff] %v2244_v3 }
 0x17f   : > { %1255 = vst [vmem:[%s2071_s16 + $0x80] sm:$0xff] %v2246_v15  ;;  %1256 = vst [vmem:[%s2071_s16 + $0x88] sm:$0xff] %v2248_v26 }
 0x180   : > { %1257 = vst [vmem:[%s2071_s16 + $0x90] sm:$0xff] %v2250_v37  ;;  %1258 = vst [vmem:[%s2071_s16 + $0x98] sm:$0xff] %v2252_v50 }
 0x181   : > { %1259 = vst [vmem:[%s2071_s16 + $0xa0] sm:$0xff] %v2254_v62  ;;  %1260 = vst [vmem:[%s2071_s16 + $0xa8] sm:$0xff] %v2256_v10 }
 0x182   : > { %1261 = vst [vmem:[%s2071_s16 + $0xb0] sm:$0xff] %v2258_v23  ;;  %1262 = vst [vmem:[%s2071_s16 + $0xb8] sm:$0xff] %v2260_v36 }
 0x183   : > { %1263 = vst [vmem:[%s2071_s16 + $0xc0] sm:$0xff] %v2262_v51  ;;  %1264 = vst [vmem:[%s2071_s16 + $0xc8] sm:$0xff] %v2264_v0 }
 0x184   : > { %1265 = vst [vmem:[%s2071_s16 + $0xd0] sm:$0xff] %v2266_v16  ;;  %1266 = vst [vmem:[%s2071_s16 + $0xd8] sm:$0xff] %v2268_v30 }
 0x185   : > { %1267 = vst [vmem:[%s2071_s16 + $0xe0] sm:$0xff] %v2270_v43  ;;  %1268 = vst [vmem:[%s2071_s16 + $0xe8] sm:$0xff] %v2272_v60 }
 0x186   : > { %1269 = vst [vmem:[%s2071_s16 + $0xf0] sm:$0xff] %v2274_v8  ;;  %1270 = vst [vmem:[%s2071_s16 + $0xf8] sm:$0xff] %v2276_v13 }
 0x187 PF: > { %p1556_p8 = scmp.eq.s32.totalorder %s1973_s9, 0 }
 0x189   : > { %1274 = sbr.rel (%p1556_p8) target bundleno = 417 (0x1a1), region = 36 }
 0x18e   : > { %v1275_v17 = vld [vmem:[%s2071_s16] sm:$0xff]  ;;  %v1276_v18 = vld [vmem:[%s2071_s16 + $0x8] sm:$0xff]  ;;  %v1277_v19 = vld [vmem:[%s2071_s16 + $0x10] sm:$0xff] }
 0x18f   : > { %v1307_v21 = vadd.f32 %v1275_v17, %v2214_v48  ;;  %v1308_v22 = vadd.f32 %v1276_v18, %v2216_v57  ;;  %v1309_v25 = vadd.f32 %v1277_v19, %v2218_v2  ;;  %v1278_v27 = vld [vmem:[%s2071_s16 + $0x18] sm:$0xff]  ;;  %v1279_v28 = vld [vmem:[%s2071_s16 + $0x20] sm:$0xff]  ;;  %v1280_v31 = vld [vmem:[%s2071_s16 + $0x28] sm:$0xff] }
 0x190   : > { %v1310_v32 = vadd.f32 %v1278_v27, %v2220_v11  ;;  %v1311_v33 = vadd.f32 %v1279_v28, %v2222_v20  ;;  %v1312_v35 = vadd.f32 %v1280_v31, %v2224_v29  ;;  %v1281_v48 = vld [vmem:[%s2071_s16 + $0x30] sm:$0xff]  ;;  %v1282_v39 = vld [vmem:[%s2071_s16 + $0x38] sm:$0xff]  ;;  %v1283_v57 = vld [vmem:[%s2071_s16 + $0x40] sm:$0xff] }
 0x191   : > { %1339 = vst [vmem:[%s2071_s16] sm:$0xff] %v1307_v21  ;;  %1340 = vst [vmem:[%s2071_s16 + $0x8] sm:$0xff] %v1308_v22  ;;  %v1313_v2 = vadd.f32 %v1281_v48, %v2226_v38  ;;  %v1314_v11 = vadd.f32 %v1282_v39, %v2228_v47  ;;  %v1315_v20 = vadd.f32 %v1283_v57, %v2230_v58  ;;  %v1284_v40 = vld [vmem:[%s2071_s16 + $0x48] sm:$0xff]  ;;  %v1285_v29 = vld [vmem:[%s2071_s16 + $0x50] sm:$0xff] }
 0x192   : > { %1341 = vst [vmem:[%s2071_s16 + $0x10] sm:$0xff] %v1309_v25  ;;  %v1286_v41 = vld [vmem:[%s2071_s16 + $0x58] sm:$0xff]  ;;  %1342 = vst [vmem:[%s2071_s16 + $0x18] sm:$0xff] %v1310_v32  ;;  %v1316_v42 = vadd.f32 %v1284_v40, %v2232_v4  ;;  %v1317_v38 = vadd.f32 %v1285_v29, %v2234_v14  ;;  %v1287_v45 = vld [vmem:[%s2071_s16 + $0x60] sm:$0xff] }
 0x193   : > { %1343 = vst [vmem:[%s2071_s16 + $0x20] sm:$0xff] %v1311_v33  ;;  %1344 = vst [vmem:[%s2071_s16 + $0x28] sm:$0xff] %v1312_v35  ;;  %v1318_v47 = vadd.f32 %v1286_v41, %v2236_v24  ;;  %v1288_v58 = vld [vmem:[%s2071_s16 + $0x68] sm:$0xff]  ;;  %v1289_v46 = vld [vmem:[%s2071_s16 + $0x70] sm:$0xff]  ;;  %v1319_v49 = vadd.f32 %v1287_v45, %v2238_v34 }
 0x194   : > { %1345 = vst [vmem:[%s2071_s16 + $0x30] sm:$0xff] %v1313_v2  ;;  %1346 = vst [vmem:[%s2071_s16 + $0x38] sm:$0xff] %v1314_v11  ;;  %v1320_v4 = vadd.f32 %v1288_v58, %v2240_v44  ;;  %v1321_v14 = vadd.f32 %v1289_v46, %v2242_v55  ;;  %v1290_v52 = vld [vmem:[%s2071_s16 + $0x78] sm:$0xff]  ;;  %v1291_v24 = vld [vmem:[%s2071_s16 + $0x80] sm:$0xff] }
 0x195   : > { %1347 = vst [vmem:[%s2071_s16 + $0x40] sm:$0xff] %v1315_v20  ;;  %v1292_v53 = vld [vmem:[%s2071_s16 + $0x88] sm:$0xff]  ;;  %1348 = vst [vmem:[%s2071_s16 + $0x48] sm:$0xff] %v1316_v42  ;;  %v1322_v54 = vadd.f32 %v1290_v52, %v2244_v3  ;;  %v1323_v34 = vadd.f32 %v1291_v24, %v2246_v15  ;;  %v1293_v56 = vld [vmem:[%s2071_s16 + $0x90] sm:$0xff] }
 0x196   : > { %1349 = vst [vmem:[%s2071_s16 + $0x50] sm:$0xff] %v1317_v38  ;;  %1350 = vst [vmem:[%s2071_s16 + $0x58] sm:$0xff] %v1318_v47  ;;  %v1324_v44 = vadd.f32 %v1292_v53, %v2248_v26  ;;  %v1294_v55 = vld [vmem:[%s2071_s16 + $0x98] sm:$0xff]  ;;  %v1295_v59 = vld [vmem:[%s2071_s16 + $0xa0] sm:$0xff]  ;;  %v1325_v61 = vadd.f32 %v1293_v56, %v2250_v37 }
 0x197   : > { %1351 = vst [vmem:[%s2071_s16 + $0x60] sm:$0xff] %v1319_v49  ;;  %1352 = vst [vmem:[%s2071_s16 + $0x68] sm:$0xff] %v1320_v4  ;;  %v1326_v3 = vadd.f32 %v1294_v55, %v2252_v50  ;;  %v1327_v15 = vadd.f32 %v1295_v59, %v2254_v62  ;;  %v1296_v63 = vld [vmem:[%s2071_s16 + $0xa8] sm:$0xff]  ;;  %v1297_v26 = vld [vmem:[%s2071_s16 + $0xb0] sm:$0xff] }
 0x198   : > { %1353 = vst [vmem:[%s2071_s16 + $0x70] sm:$0xff] %v1321_v14  ;;  %v1298_v1 = vld [vmem:[%s2071_s16 + $0xb8] sm:$0xff]  ;;  %1354 = vst [vmem:[%s2071_s16 + $0x78] sm:$0xff] %v1322_v54  ;;  %v1328_v5 = vadd.f32 %v1296_v63, %v2256_v10  ;;  %v1329_v37 = vadd.f32 %v1297_v26, %v2258_v23  ;;  %v1299_v6 = vld [vmem:[%s2071_s16 + $0xc0] sm:$0xff] }
 0x199   : > { %1355 = vst [vmem:[%s2071_s16 + $0x80] sm:$0xff] %v1323_v34  ;;  %1356 = vst [vmem:[%s2071_s16 + $0x88] sm:$0xff] %v1324_v44  ;;  %v1330_v50 = vadd.f32 %v1298_v1, %v2260_v36  ;;  %v1300_v62 = vld [vmem:[%s2071_s16 + $0xc8] sm:$0xff]  ;;  %v1301_v7 = vld [vmem:[%s2071_s16 + $0xd0] sm:$0xff]  ;;  %v1331_v9 = vadd.f32 %v1299_v6, %v2262_v51 }
 0x19a   : > { %1357 = vst [vmem:[%s2071_s16 + $0x90] sm:$0xff] %v1325_v61  ;;  %1358 = vst [vmem:[%s2071_s16 + $0x98] sm:$0xff] %v1326_v3  ;;  %v1332_v10 = vadd.f32 %v1300_v62, %v2264_v0  ;;  %v1333_v23 = vadd.f32 %v1301_v7, %v2266_v16  ;;  %v1302_v12 = vld [vmem:[%s2071_s16 + $0xd8] sm:$0xff]  ;;  %v1303_v36 = vld [vmem:[%s2071_s16 + $0xe0] sm:$0xff] }
 0x19b   : > { %1359 = vst [vmem:[%s2071_s16 + $0xa0] sm:$0xff] %v1327_v15  ;;  %v1304_v17 = vld [vmem:[%s2071_s16 + $0xe8] sm:$0xff]  ;;  %1360 = vst [vmem:[%s2071_s16 + $0xa8] sm:$0xff] %v1328_v5  ;;  %v1334_v18 = vadd.f32 %v1302_v12, %v2268_v30  ;;  %v1335_v51 = vadd.f32 %v1303_v36, %v2270_v43  ;;  %v1305_v0 = vld [vmem:[%s2071_s16 + $0xf0] sm:$0xff] }
 0x19c   : > { %1361 = vst [vmem:[%s2071_s16 + $0xb0] sm:$0xff] %v1329_v37  ;;  %1362 = vst [vmem:[%s2071_s16 + $0xb8] sm:$0xff] %v1330_v50  ;;  %v1336_v19 = vadd.f32 %v1304_v17, %v2272_v60  ;;  %v1306_v21 = vld [vmem:[%s2071_s16 + $0xf8] sm:$0xff]  ;;  %v1337_v16 = vadd.f32 %v1305_v0, %v2274_v8 }
 0x19d   : > { %1363 = vst [vmem:[%s2071_s16 + $0xc0] sm:$0xff] %v1331_v9  ;;  %1364 = vst [vmem:[%s2071_s16 + $0xc8] sm:$0xff] %v1332_v10  ;;  %v1338_v22 = vadd.f32 %v1306_v21, %v2276_v13 }
 0x19e   : > { %1365 = vst [vmem:[%s2071_s16 + $0xd0] sm:$0xff] %v1333_v23  ;;  %1366 = vst [vmem:[%s2071_s16 + $0xd8] sm:$0xff] %v1334_v18 }
 0x19f   : > { %1367 = vst [vmem:[%s2071_s16 + $0xe0] sm:$0xff] %v1335_v51  ;;  %1368 = vst [vmem:[%s2071_s16 + $0xe8] sm:$0xff] %v1336_v19 }
 0x1a0   : > { %1369 = vst [vmem:[%s2071_s16 + $0xf0] sm:$0xff] %v1337_v16  ;;  %1370 = vst [vmem:[%s2071_s16 + $0xf8] sm:$0xff] %v1338_v22 }
 0x1a1 PF: > { %s12_s13 = sadd.s32 1, %s1989_s13   ;;  %s2458_s9 = smov %s1981_s11 }
 0x1a2   : > { %p9_p9 = scmp.ge.s32.totalorder %s12_s13, 8   ;;  %s2459_s10 = smov %s1985_s12 }
 0x1a3   : > { %s2460_s11 = smov %s2463_s14  ;;  %s2461_s12 = smov %s2467_s15 }
 0x1a4   :  { %11 = sbr.rel (!%p9_p9) target bundleno = 3 (0x3), region = 66 }

// kernel: rgcn_model_forward.3
= control target key start
LH: loop header
LB: loop body
LE: loop exit
PB: predicated region body
PF: predicated region fallthrough
CT: control target
= control target key end

     0   :  { %7 = vsyncpa [#allocation3], 0  ;;  %s2649_s0 = inlined_call_operand.vmem [shape: bf16[3,512,512], index: 0, kind: input, shape index: {}]   ;;  %s2650_s1 = inlined_call_operand.vmem [shape: bf16[512,128], index: 1, kind: input, shape index: {}]   ;;  %s2651_s2 = inlined_call_operand.hbm [shape: f32[512,128], index: 2, kind: output, shape index: {}]  }
   0x1   :  { %9 = vsyncpa [#allocation3 + $0x1], 0  ;;  %s2116_s9 = smov 0   ;;  %s2118_s10 = smov 0  }
   0x2   :  { %s2120_s11 = smov 0   ;;  %s2122_s12 = smov 0  }
   0x3   :  { %s2124_s13 = smov 0   ;;  %s2126_s14 = smov 0  }
   0x4   :  { %s2128_s15 = smov 0   ;;  %s2130_s16 = smov 0  }
   0x5 LB: > { %s1465_s17 = sadd.s32 4294967295, %s2096_s16   ;;  %s1466_s18 = sadd.s32 4294967294, %s2096_s16   ;;  %s2096_s16 = sphi %s2130_s16, %s15_s16   ;;  %s2092_s15 = sphi %s2128_s15, %s2660_s15   ;;  %s2088_s14 = sphi %s2126_s14, %s2659_s14   ;;  %s2084_s13 = sphi %s2124_s13, %s2658_s13   ;;  %s2080_s12 = sphi %s2122_s12, %s2657_s12   ;;  %s2076_s11 = sphi %s2120_s11, %s2656_s11   ;;  %s2072_s10 = sphi %s2118_s10, %s2655_s10   ;;  %s2068_s9 = sphi %s2116_s9, %s2654_s9  }
   0x6   : > { %s24_s19 = sadd.s32 1, %s2088_s14  ;;  %s27_s20 = sadd.s32 1, %s2092_s15 }
   0x7   : > { %p25_p0 = scmp.ge.s32.totalorder %s24_s19, 3  ;;  %p93_p1 = scmp.ne.s32.totalorder %s2076_s11, %s2072_s10 }
   0x8   : > { %p94_p2 = scmp.eq.s32.totalorder %s1465_s17, 5  ;;  %p99_p4 = scmp.ne.s32.totalorder %s2072_s10, %s2068_s9 }
   0x9   : > { %s2662_s19 = smov (%p25_p0, %s24_s19), 0  ;;  %s2664_s20 = smov (!%p25_p0, %s27_s20), %s2092_s15 }
   0xa   : > { %p2165_p3 = por %p94_p2, %p93_p1  ;;  %p29_p5 = scmp.ge.s32.totalorder %s2664_s20, 2 }
   0xb   : > { %p100_p6 = scmp.eq.s32.totalorder %s1466_s18, 5  ;;  %p1469_p7 = scmp.ge.s32.totalorder %s2096_s16, 1 }
   0xc   : > { %p135_p8 = scmp.lt.s32.totalorder %s2096_s16, 7  ;;  %s2666_s20 = smov (%p29_p5, %s2664_s20), 0 }
   0xd   : > { %p2175_p9 = por %p100_p6, %p99_p4  ;;  %s80_s23 = ssub.s32 %s2092_s15, %s2666_s20 }
   0xe   : > { %p136_p10 = pnand %p1469_p7, %p135_p8  ;;  %s83_s24 = sadd.s32 1, %s2076_s11 }
   0xf   : > { %p81_p11 = scmp.eq.s32.totalorder %s80_s23, 0  ;;  %s159_s26 = sand.u32 (!%p136_p10), 1, %s2072_s10  }
  0x10   : > { %139 = sbr.rel (%p136_p10) target bundleno = 448 (0x1c0), region = 28  ;;  %s2191_s29 = sshll.u32 (!%p136_p10), %s159_s26, 8 }
  0x11   : > { %s2183_s25 = scalar_select %p81_p11, %s2076_s11, %s83_s24  }
  0x12   : > { %s1471_s7 = sshll.u32 (!%p136_p10), %s2084_s13, 5  ;;  %p163_p12 = scmp.lt.s32.totalorder (!%p136_p10), %s2080_s12, 2 }
  0x13   : > { %p165_p13 = scmp.lt.s32.totalorder (!%p136_p10), %s1471_s7, 63  ;;  %p1571_p0 = scmp.ne.s32.totalorder (!%p136_p10), %s2080_s12, 0 }
  0x15   : > { %v1876_v0 = vld [vmem:[%s2650_s1 + $0x78] sm:$0xff]   ;;  %v1880_v4 = vld [vmem:[%s2650_s1 + $0x70] sm:$0xff]   ;;  %v1884_v8 = vld [vmem:[%s2650_s1 + $0x68] sm:$0xff]   ;;  %s164_s8 = scalar_select %p163_p12, %s2080_s12, 2 }
  0x16   : > { %v1877_v1 = vld [vmem:[%s2650_s1 + $0xf8] sm:$0xff]   ;;  %1579 = vmatprep.subr.bf16.mxu0 %v1876_v0  ;;  %v1881_v5 = vld [vmem:[%s2650_s1 + $0xf0] sm:$0xff]   ;;  %v1885_v9 = vld [vmem:[%s2650_s1 + $0xe8] sm:$0xff]   ;;  %s2668_s7 = smov (!%p165_p13, %s1471_s7), 63 }
  0x17   : > { %v1878_v2 = vld [vmem:[%s2650_s1 + $0x38] sm:$0xff]   ;;  %1691 = vmatprep.subr.bf16.mxu1 %v1877_v1  ;;  %v1882_v6 = vld [vmem:[%s2650_s1 + $0x30] sm:$0xff]   ;;  %v1886_v10 = vld [vmem:[%s2650_s1 + $0x28] sm:$0xff]   ;;  %s1473_s4 = sshll.u32 %s164_s8, 8  ;;  %s1472_s17 = sshll.u32 %s2668_s7, 2 }
  0x18   : > { %v1879_v3 = vld [vmem:[%s2650_s1 + $0xb8] sm:$0xff]   ;;  %1580 = vmatpush3.bf16.msra.mxu0 %v1878_v2  ;;  %v1883_v7 = vld [vmem:[%s2650_s1 + $0xb0] sm:$0xff]   ;;  %v1887_v11 = vld [vmem:[%s2650_s1 + $0xa8] sm:$0xff]   ;;  %s169_s8 = sadd.s32 %s1473_s4, %s1472_s17 }
  0x19   : > { %1692 = vmatpush3.bf16.msra.mxu1 %v1879_v3  ;;  %1581 = vmatprep.subr.bf16.mxu0 %v1880_v4  ;;  %v1888_v12 = vld [vmem:[%s2650_s1 + $0x60] sm:$0xff]   ;;  %v1892_v16 = vld [vmem:[%s2650_s1 + $0x58] sm:$0xff]   ;;  %v1896_v20 = vld [vmem:[%s2650_s1 + $0x50] sm:$0xff]   ;;  %s1474_s24 = sshll.u32 %s169_s8, 2 }
  0x1a   : > { %1693 = vmatprep.subr.bf16.mxu1 %v1881_v5  ;;  %v1889_v13 = vld [vmem:[%s2650_s1 + $0xe0] sm:$0xff]   ;;  %v1893_v17 = vld [vmem:[%s2650_s1 + $0xd8] sm:$0xff]   ;;  %v1897_v21 = vld [vmem:[%s2650_s1 + $0xd0] sm:$0xff]   ;;  %s2286_s6 = scalar_lea.vmem %s2649_s0, %s1474_s24  ;;  %s2423_s24 = scalar_lea.vmem [#allocation2], %s2191_s29 }
  0x1b   : > { %v1890_v14 = vld [vmem:[%s2650_s1 + $0x20] sm:$0xff]   ;;  %v1894_v18 = vld [vmem:[%s2650_s1 + $0x18] sm:$0xff]   ;;  %v1898_v22 = vld [vmem:[%s2650_s1 + $0x10] sm:$0xff]  }
  0x1c   : > { %1582 = vmatpush3.bf16.msra.mxu0 %v1882_v6  ;;  %v1891_v15 = vld [vmem:[%s2650_s1 + $0xa0] sm:$0xff]   ;;  %v1895_v19 = vld [vmem:[%s2650_s1 + $0x98] sm:$0xff]   ;;  %v1899_v23 = vld [vmem:[%s2650_s1 + $0x90] sm:$0xff]  }
  0x1d   : > { %1694 = vmatpush3.bf16.msra.mxu1 %v1883_v7  ;;  %1583 = vmatprep.subr.bf16.mxu0 %v1884_v8  ;;  %v1900_v24 = vld [vmem:[%s2650_s1 + $0x48] sm:$0xff]   ;;  %v1904_v28 = vld [vmem:[%s2650_s1 + $0x40] sm:$0xff]  }
  0x1e   : > { %1695 = vmatprep.subr.bf16.mxu1 %v1885_v9  ;;  %v1901_v25 = vld [vmem:[%s2650_s1 + $0xc8] sm:$0xff]   ;;  %v1905_v29 = vld [vmem:[%s2650_s1 + $0xc0] sm:$0xff]  }
  0x1f   : > { %v1902_v26 = vld [vmem:[%s2650_s1 + $0x8] sm:$0xff]   ;;  %v1906_v30 = vld [vmem:[%s2650_s1] sm:$0xff]  }
  0x20   : > { %1584 = vmatpush3.bf16.msra.mxu0 %v1886_v10  ;;  %v1903_v27 = vld [vmem:[%s2650_s1 + $0x88] sm:$0xff]   ;;  %v1907_v31 = vld [vmem:[%s2650_s1 + $0x80] sm:$0xff]  }
  0x21   : > { %1696 = vmatpush3.bf16.msra.mxu1 %v1887_v11  ;;  %1585 = vmatprep.subr.bf16.mxu0 %v1888_v12  ;;  %v1908_v32 = vld [vmem:[%s2286_s6] ss:$16 sps:$4 sm:$0xff]   ;;  %v1910_v33 = vld [vmem:[%s2286_s6 + $0x4] ss:$16 sps:$4 sm:$0xff]   ;;  %v1911_v34 = vld [vmem:[%s2286_s6 + $0x8] ss:$16 sps:$4 sm:$0xff]  }
  0x22   : > { %1697 = vmatprep.subr.bf16.mxu1 %v1889_v13  ;;  %v1913_v35 = vld [vmem:[%s2286_s6 + $0xc] ss:$16 sps:$4 sm:$0xff]   ;;  %847 = vmatprep.mubr.bf16.mxu0 %v1910_v33  ;;  %v1914_v36 = vld [vmem:[%s2286_s6 + $0x24] ss:$16 sps:$4 sm:$0xff]   ;;  %v1918_v38 = vld [vmem:[%s2286_s6 + $0x20] ss:$16 sps:$4 sm:$0xff]  }
  0x23   : > { %1008 = vmatprep.mubr.bf16.mxu1 %v1913_v35  ;;  %v1916_v37 = vld [vmem:[%s2286_s6 + $0x2c] ss:$16 sps:$4 sm:$0xff]   ;;  %v1919_v39 = vld [vmem:[%s2286_s6 + $0x28] ss:$16 sps:$4 sm:$0xff]   ;;  %v1920_v40 = vld [vmem:[%s2286_s6 + $0x44] ss:$16 sps:$4 sm:$0xff]  }
  0x24   : > { %1586 = vmatpush3.bf16.msra.mxu0 %v1890_v14  ;;  %v1922_v41 = vld [vmem:[%s2286_s6 + $0x4c] ss:$16 sps:$4 sm:$0xff]   ;;  %v1924_v42 = vld [vmem:[%s2286_s6 + $0x40] ss:$16 sps:$4 sm:$0xff]   ;;  %v1925_v43 = vld [vmem:[%s2286_s6 + $0x48] ss:$16 sps:$4 sm:$0xff]  }
  0x25   : > { %1698 = vmatpush3.bf16.msra.mxu1 %v1891_v15  ;;  %1587 = vmatprep.subr.bf16.mxu0 %v1892_v16  ;;  %v1926_v44 = vld [vmem:[%s2286_s6 + $0x64] ss:$16 sps:$4 sm:$0xff]   ;;  %v1928_v45 = vld [vmem:[%s2286_s6 + $0x6c] ss:$16 sps:$4 sm:$0xff]   ;;  %v1930_v46 = vld [vmem:[%s2286_s6 + $0x60] ss:$16 sps:$4 sm:$0xff]  }
  0x26   : > { %1699 = vmatprep.subr.bf16.mxu1 %v1893_v17  ;;  %v1931_v47 = vld [vmem:[%s2286_s6 + $0x68] ss:$16 sps:$4 sm:$0xff]   ;;  %v1932_v48 = vld [vmem:[%s2286_s6 + $0x84] ss:$16 sps:$4 sm:$0xff]   ;;  %v1934_v49 = vld [vmem:[%s2286_s6 + $0x8c] ss:$16 sps:$4 sm:$0xff]  }
  0x27   : > { %v1936_v50 = vld [vmem:[%s2286_s6 + $0x80] ss:$16 sps:$4 sm:$0xff]   ;;  %v1937_v51 = vld [vmem:[%s2286_s6 + $0x88] ss:$16 sps:$4 sm:$0xff]   ;;  %v1938_v52 = vld [vmem:[%s2286_s6 + $0xa4] ss:$16 sps:$4 sm:$0xff]  }
  0x28   : > { %1588 = vmatpush3.bf16.msra.mxu0 %v1894_v18  ;;  %v1940_v53 = vld [vmem:[%s2286_s6 + $0xac] ss:$16 sps:$4 sm:$0xff]   ;;  %v1942_v54 = vld [vmem:[%s2286_s6 + $0xa0] ss:$16 sps:$4 sm:$0xff]   ;;  %v1943_v55 = vld [vmem:[%s2286_s6 + $0xa8] ss:$16 sps:$4 sm:$0xff]  }
  0x29   : > { %1700 = vmatpush3.bf16.msra.mxu1 %v1895_v19  ;;  %1589 = vmatprep.subr.bf16.mxu0 %v1896_v20  ;;  %v1944_v56 = vld [vmem:[%s2286_s6 + $0xc4] ss:$16 sps:$4 sm:$0xff]   ;;  %v1946_v57 = vld [vmem:[%s2286_s6 + $0xcc] ss:$16 sps:$4 sm:$0xff]   ;;  %v1948_v58 = vld [vmem:[%s2286_s6 + $0xc0] ss:$16 sps:$4 sm:$0xff]  }
  0x2a   : > { %1701 = vmatprep.subr.bf16.mxu1 %v1897_v21  ;;  %v1949_v59 = vld [vmem:[%s2286_s6 + $0xc8] ss:$16 sps:$4 sm:$0xff]   ;;  %v1950_v60 = vld [vmem:[%s2286_s6 + $0xe4] ss:$16 sps:$4 sm:$0xff]   ;;  %v1952_v61 = vld [vmem:[%s2286_s6 + $0xec] ss:$16 sps:$4 sm:$0xff]  }
  0x2b   : > { %v1954_v62 = vld [vmem:[%s2286_s6 + $0xe0] ss:$16 sps:$4 sm:$0xff]   ;;  %v1955_v63 = vld [vmem:[%s2286_s6 + $0xe8] ss:$16 sps:$4 sm:$0xff]   ;;  %v1956_v0 = vld [vmem:[%s2286_s6 + $0x104] ss:$16 sps:$4 sm:$0xff]  }
  0x2c   : > { %1590 = vmatpush3.bf16.msra.mxu0 %v1898_v22  ;;  %v1958_v1 = vld [vmem:[%s2286_s6 + $0x10c] ss:$16 sps:$4 sm:$0xff]   ;;  %v1960_v2 = vld [vmem:[%s2286_s6 + $0x100] ss:$16 sps:$4 sm:$0xff]   ;;  %v1961_v3 = vld [vmem:[%s2286_s6 + $0x108] ss:$16 sps:$4 sm:$0xff]  }
  0x2d   : > { %1702 = vmatpush3.bf16.msra.mxu1 %v1899_v23  ;;  %1591 = vmatprep.subr.bf16.mxu0 %v1900_v24  ;;  %v1962_v4 = vld [vmem:[%s2286_s6 + $0x124] ss:$16 sps:$4 sm:$0xff]   ;;  %v1964_v5 = vld [vmem:[%s2286_s6 + $0x12c] ss:$16 sps:$4 sm:$0xff]   ;;  %v1966_v6 = vld [vmem:[%s2286_s6 + $0x120] ss:$16 sps:$4 sm:$0xff]  }
  0x2e   : > { %1703 = vmatprep.subr.bf16.mxu1 %v1901_v25  ;;  %v1967_v7 = vld [vmem:[%s2286_s6 + $0x128] ss:$16 sps:$4 sm:$0xff]   ;;  %v1968_v8 = vld [vmem:[%s2286_s6 + $0x144] ss:$16 sps:$4 sm:$0xff]   ;;  %v1970_v9 = vld [vmem:[%s2286_s6 + $0x14c] ss:$16 sps:$4 sm:$0xff]  }
  0x2f   : > { %v1972_v10 = vld [vmem:[%s2286_s6 + $0x140] ss:$16 sps:$4 sm:$0xff]   ;;  %v1973_v11 = vld [vmem:[%s2286_s6 + $0x148] ss:$16 sps:$4 sm:$0xff]   ;;  %v1974_v12 = vld [vmem:[%s2286_s6 + $0x164] ss:$16 sps:$4 sm:$0xff]  }
  0x30   : > { %1592 = vmatpush3.bf16.msra.mxu0 %v1902_v26  ;;  %v1976_v13 = vld [vmem:[%s2286_s6 + $0x16c] ss:$16 sps:$4 sm:$0xff]   ;;  %v1978_v14 = vld [vmem:[%s2286_s6 + $0x160] ss:$16 sps:$4 sm:$0xff]   ;;  %v1979_v15 = vld [vmem:[%s2286_s6 + $0x168] ss:$16 sps:$4 sm:$0xff]  }
  0x31   : > { %1704 = vmatpush3.bf16.msra.mxu1 %v1903_v27  ;;  %1593 = vmatprep.subr.bf16.mxu0 %v1904_v28  ;;  %v1980_v16 = vld [vmem:[%s2286_s6 + $0x184] ss:$16 sps:$4 sm:$0xff]   ;;  %v1982_v17 = vld [vmem:[%s2286_s6 + $0x18c] ss:$16 sps:$4 sm:$0xff]   ;;  %v1984_v18 = vld [vmem:[%s2286_s6 + $0x180] ss:$16 sps:$4 sm:$0xff]  }
  0x32   : > { %1705 = vmatprep.subr.bf16.mxu1 %v1905_v29  ;;  %v1985_v19 = vld [vmem:[%s2286_s6 + $0x188] ss:$16 sps:$4 sm:$0xff]   ;;  %v1986_v20 = vld [vmem:[%s2286_s6 + $0x1a4] ss:$16 sps:$4 sm:$0xff]   ;;  %v1988_v21 = vld [vmem:[%s2286_s6 + $0x1ac] ss:$16 sps:$4 sm:$0xff]  }
  0x33   : > { %v1990_v22 = vld [vmem:[%s2286_s6 + $0x1a0] ss:$16 sps:$4 sm:$0xff]   ;;  %v1991_v23 = vld [vmem:[%s2286_s6 + $0x1a8] ss:$16 sps:$4 sm:$0xff]   ;;  %v1992_v24 = vld [vmem:[%s2286_s6 + $0x1c4] ss:$16 sps:$4 sm:$0xff]  }
  0x34   : > { %1594 = vmatpush3.bf16.msra.mxu0 %v1906_v30  ;;  %v1994_v25 = vld [vmem:[%s2286_s6 + $0x1cc] ss:$16 sps:$4 sm:$0xff]   ;;  %v1996_v26 = vld [vmem:[%s2286_s6 + $0x1c0] ss:$16 sps:$4 sm:$0xff]   ;;  %v1997_v27 = vld [vmem:[%s2286_s6 + $0x1c8] ss:$16 sps:$4 sm:$0xff]  }
  0x35   : > { %1706 = vmatpush3.bf16.msra.mxu1 %v1907_v31  ;;  %v1998_v28 = vld [vmem:[%s2286_s6 + $0x1e4] ss:$16 sps:$4 sm:$0xff]   ;;  %v2000_v29 = vld [vmem:[%s2286_s6 + $0x1ec] ss:$16 sps:$4 sm:$0xff]   ;;  %v2002_v30 = vld [vmem:[%s2286_s6 + $0x1e0] ss:$16 sps:$4 sm:$0xff]  }
  0x36   : > { %v2003_v31 = vld [vmem:[%s2286_s6 + $0x1e8] ss:$16 sps:$4 sm:$0xff]  }
  0x37   : > { %848 = vmatmul.mubr.bf16.vlgmr.msra.gmra.mxu0 %v1908_v32 }
  0x38   : > { %1009 = vmatmul.mubr.bf16.vlgmr.msra.gmra.mxu1 %v1911_v34  ;;  %855 = vmatprep.mubr.bf16.mxu0 %v1914_v36 }
  0x39   : > { %1016 = vmatprep.mubr.bf16.mxu1 %v1916_v37 }
  0x3f   : > { %856 = vmatmul.mubr.bf16.gmra.mxu0 %v1918_v38 }
  0x40   : > { %1017 = vmatmul.mubr.bf16.gmra.mxu1 %v1919_v39  ;;  %863 = vmatprep.mubr.bf16.mxu0 %v1920_v40 }
  0x41   : > { %1024 = vmatprep.mubr.bf16.mxu1 %v1922_v41 }
  0x47   : > { %864 = vmatmul.mubr.bf16.gmra.mxu0 %v1924_v42 }
  0x48   : > { %1025 = vmatmul.mubr.bf16.gmra.mxu1 %v1925_v43  ;;  %871 = vmatprep.mubr.bf16.mxu0 %v1926_v44 }
  0x49   : > { %1032 = vmatprep.mubr.bf16.mxu1 %v1928_v45 }
  0x4f   : > { %872 = vmatmul.mubr.bf16.gmra.mxu0 %v1930_v46 }
  0x50   : > { %1033 = vmatmul.mubr.bf16.gmra.mxu1 %v1931_v47  ;;  %879 = vmatprep.mubr.bf16.mxu0 %v1932_v48 }
  0x51   : > { %1040 = vmatprep.mubr.bf16.mxu1 %v1934_v49 }
  0x57   : > { %880 = vmatmul.mubr.bf16.gmra.mxu0 %v1936_v50 }
  0x58   : > { %1041 = vmatmul.mubr.bf16.gmra.mxu1 %v1937_v51  ;;  %887 = vmatprep.mubr.bf16.mxu0 %v1938_v52 }
  0x59   : > { %1048 = vmatprep.mubr.bf16.mxu1 %v1940_v53 }
  0x5f   : > { %888 = vmatmul.mubr.bf16.gmra.mxu0 %v1942_v54 }
  0x60   : > { %1049 = vmatmul.mubr.bf16.gmra.mxu1 %v1943_v55  ;;  %895 = vmatprep.mubr.bf16.mxu0 %v1944_v56 }
  0x61   : > { %1056 = vmatprep.mubr.bf16.mxu1 %v1946_v57 }
  0x67   : > { %896 = vmatmul.mubr.bf16.gmra.mxu0 %v1948_v58 }
  0x68   : > { %1057 = vmatmul.mubr.bf16.gmra.mxu1 %v1949_v59  ;;  %903 = vmatprep.mubr.bf16.mxu0 %v1950_v60 }
  0x69   : > { %1064 = vmatprep.mubr.bf16.mxu1 %v1952_v61 }
  0x6f   : > { %904 = vmatmul.mubr.bf16.gmra.mxu0 %v1954_v62 }
  0x70   : > { %1065 = vmatmul.mubr.bf16.gmra.mxu1 %v1955_v63  ;;  %911 = vmatprep.mubr.bf16.mxu0 %v1956_v0 }
  0x71   : > { %1072 = vmatprep.mubr.bf16.mxu1 %v1958_v1 }
  0x77   : > { %912 = vmatmul.mubr.bf16.gmra.mxu0 %v1960_v2 }
  0x78   : > { %1073 = vmatmul.mubr.bf16.gmra.mxu1 %v1961_v3  ;;  %919 = vmatprep.mubr.bf16.mxu0 %v1962_v4 }
  0x79   : > { %1080 = vmatprep.mubr.bf16.mxu1 %v1964_v5 }
  0x7f   : > { %920 = vmatmul.mubr.bf16.gmra.mxu0 %v1966_v6 }
  0x80   : > { %1081 = vmatmul.mubr.bf16.gmra.mxu1 %v1967_v7  ;;  %927 = vmatprep.mubr.bf16.mxu0 %v1968_v8 }
  0x81   : > { %1088 = vmatprep.mubr.bf16.mxu1 %v1970_v9 }
  0x87   : > { %928 = vmatmul.mubr.bf16.gmra.mxu0 %v1972_v10 }
  0x88   : > { %1089 = vmatmul.mubr.bf16.gmra.mxu1 %v1973_v11  ;;  %935 = vmatprep.mubr.bf16.mxu0 %v1974_v12 }
  0x89   : > { %1096 = vmatprep.mubr.bf16.mxu1 %v1976_v13 }
  0x8f   : > { %936 = vmatmul.mubr.bf16.gmra.mxu0 %v1978_v14 }
  0x90   : > { %1097 = vmatmul.mubr.bf16.gmra.mxu1 %v1979_v15  ;;  %943 = vmatprep.mubr.bf16.mxu0 %v1980_v16 }
  0x91   : > { %1104 = vmatprep.mubr.bf16.mxu1 %v1982_v17 }
  0x97   : > { %944 = vmatmul.mubr.bf16.gmra.mxu0 %v1984_v18 }
  0x98   : > { %1105 = vmatmul.mubr.bf16.gmra.mxu1 %v1985_v19  ;;  %951 = vmatprep.mubr.bf16.mxu0 %v1986_v20 }
  0x99   : > { %1112 = vmatprep.mubr.bf16.mxu1 %v1988_v21 }
  0x9f   : > { %952 = vmatmul.mubr.bf16.gmra.mxu0 %v1990_v22 }
  0xa0   : > { %1113 = vmatmul.mubr.bf16.gmra.mxu1 %v1991_v23  ;;  %959 = vmatprep.mubr.bf16.mxu0 %v1992_v24 }
  0xa1   : > { %1120 = vmatprep.mubr.bf16.mxu1 %v1994_v25 }
  0xa7   : > { %960 = vmatmul.mubr.bf16.gmra.mxu0 %v1996_v26 }
  0xa8   : > { %1121 = vmatmul.mubr.bf16.gmra.mxu1 %v1997_v27  ;;  %967 = vmatprep.mubr.bf16.mxu0 %v1998_v28 }
  0xa9   : > { %1128 = vmatprep.mubr.bf16.mxu1 %v2000_v29 }
  0xaf   : > { %968 = vmatmul.mubr.bf16.gmra.mxu0 %v2002_v30 }
  0xb0   : > { %1129 = vmatmul.mubr.bf16.gmra.mxu1 %v2003_v31 }
  0xf7   : > { %v1595_v32 = vpop.f32.mrf.mxu0 }
  0xf8   : > { %v1707_v33 = vpop.f32.mrf.mxu1 }
  0xf9   : > { %v1596_v34 = vpop.f32.mrf.mxu0 }
  0xfa   : > { %v1597_v35 = vadd.f32 %v1596_v34, %v1595_v32  ;;  %v1708_v36 = vpop.f32.mrf.mxu1 }
  0xfb   : > { %v1709_v37 = vadd.f32 %v1708_v36, %v1707_v33  ;;  %v1598_v38 = vpop.f32.mrf.mxu0 }
  0xfc   : > { %v1710_v39 = vpop.f32.mrf.mxu1 }
  0xfd   : > { %v1011_v40 = vadd.f32 %v1709_v37, %v1597_v35  ;;  %v1599_v41 = vpop.f32.mrf.mxu0 }
  0xfe   : > { %v1600_v42 = vadd.f32 %v1599_v41, %v1598_v38  ;;  %v1711_v43 = vpop.f32.mrf.mxu1 }
  0xff   : > { %vm1137_vm0 = vcmp.gt.f32.partialorder %v1011_v40, 0.0  ;;  %v1169_v44 = vmul.f32 0.01, %v1011_v40  ;;  %v1712_v45 = vadd.f32 %v1711_v43, %v1710_v39  ;;  %v1601_v46 = vpop.f32.mrf.mxu0 }
 0x100   : > { %v1713_v47 = vpop.f32.mrf.mxu1 }
 0x101   : > { %v2358_v48 = vsel %vm1137_vm0, %v1011_v40, %v1169_v44  ;;  %v1014_v49 = vadd.f32 %v1712_v45, %v1600_v42  ;;  %v1602_v50 = vpop.f32.mrf.mxu0 }
 0x102   : > { %v1603_v51 = vadd.f32 %v1602_v50, %v1601_v46  ;;  %v1714_v52 = vpop.f32.mrf.mxu1 }
 0x103   : > { %vm1138_vm1 = vcmp.gt.f32.partialorder %v1014_v49, 0.0  ;;  %v1170_v53 = vmul.f32 0.01, %v1014_v49  ;;  %v1715_v54 = vadd.f32 %v1714_v52, %v1713_v47  ;;  %v1604_v55 = vpop.f32.mrf.mxu0 }
 0x104   : > { %v1716_v56 = vpop.f32.mrf.mxu1 }
 0x105   : > { %v2360_v57 = vsel %vm1138_vm1, %v1014_v49, %v1170_v53  ;;  %v1019_v58 = vadd.f32 %v1715_v54, %v1603_v51  ;;  %v1605_v59 = vpop.f32.mrf.mxu0 }
 0x106   : > { %v1606_v60 = vadd.f32 %v1605_v59, %v1604_v55  ;;  %v1717_v61 = vpop.f32.mrf.mxu1 }
 0x107   : > { %vm1139_vm2 = vcmp.gt.f32.partialorder %v1019_v58, 0.0  ;;  %v1171_v62 = vmul.f32 0.01, %v1019_v58  ;;  %v1718_v63 = vadd.f32 %v1717_v61, %v1716_v56  ;;  %v1607_v0 = vpop.f32.mrf.mxu0 }
 0x108   : > { %v1719_v1 = vpop.f32.mrf.mxu1 }
 0x109   : > { %v2362_v2 = vsel %vm1139_vm2, %v1019_v58, %v1171_v62  ;;  %v1022_v3 = vadd.f32 %v1718_v63, %v1606_v60  ;;  %v1608_v4 = vpop.f32.mrf.mxu0 }
 0x10a   : > { %v1609_v5 = vadd.f32 %v1608_v4, %v1607_v0  ;;  %v1720_v6 = vpop.f32.mrf.mxu1 }
 0x10b   : > { %vm1140_vm3 = vcmp.gt.f32.partialorder %v1022_v3, 0.0  ;;  %v1172_v7 = vmul.f32 0.01, %v1022_v3  ;;  %v1721_v8 = vadd.f32 %v1720_v6, %v1719_v1  ;;  %v1610_v9 = vpop.f32.mrf.mxu0 }
 0x10c   : > { %v1722_v10 = vpop.f32.mrf.mxu1 }
 0x10d   : > { %v2364_v11 = vsel %vm1140_vm3, %v1022_v3, %v1172_v7  ;;  %v1027_v12 = vadd.f32 %v1721_v8, %v1609_v5  ;;  %v1611_v13 = vpop.f32.mrf.mxu0 }
 0x10e   : > { %v1612_v14 = vadd.f32 %v1611_v13, %v1610_v9  ;;  %v1723_v15 = vpop.f32.mrf.mxu1 }
 0x10f   : > { %vm1141_vm4 = vcmp.gt.f32.partialorder %v1027_v12, 0.0  ;;  %v1173_v16 = vmul.f32 0.01, %v1027_v12  ;;  %v1724_v17 = vadd.f32 %v1723_v15, %v1722_v10  ;;  %v1613_v18 = vpop.f32.mrf.mxu0 }
 0x110   : > { %v1725_v19 = vpop.f32.mrf.mxu1 }
 0x111   : > { %v2366_v20 = vsel %vm1141_vm4, %v1027_v12, %v1173_v16  ;;  %v1030_v21 = vadd.f32 %v1724_v17, %v1612_v14  ;;  %v1614_v22 = vpop.f32.mrf.mxu0 }
 0x112   : > { %v1615_v23 = vadd.f32 %v1614_v22, %v1613_v18  ;;  %v1726_v24 = vpop.f32.mrf.mxu1 }
 0x113   : > { %vm1142_vm5 = vcmp.gt.f32.partialorder %v1030_v21, 0.0  ;;  %v1174_v25 = vmul.f32 0.01, %v1030_v21  ;;  %v1727_v26 = vadd.f32 %v1726_v24, %v1725_v19  ;;  %v1616_v27 = vpop.f32.mrf.mxu0 }
 0x114   : > { %v1728_v28 = vpop.f32.mrf.mxu1 }
 0x115   : > { %v2368_v29 = vsel %vm1142_vm5, %v1030_v21, %v1174_v25  ;;  %v1035_v30 = vadd.f32 %v1727_v26, %v1615_v23  ;;  %v1617_v31 = vpop.f32.mrf.mxu0 }
 0x116   : > { %v1618_v32 = vadd.f32 %v1617_v31, %v1616_v27  ;;  %v1729_v33 = vpop.f32.mrf.mxu1 }
 0x117   : > { %vm1143_vm6 = vcmp.gt.f32.partialorder %v1035_v30, 0.0  ;;  %v1175_v34 = vmul.f32 0.01, %v1035_v30  ;;  %v1730_v35 = vadd.f32 %v1729_v33, %v1728_v28  ;;  %v1619_v36 = vpop.f32.mrf.mxu0 }
 0x118   : > { %v1731_v37 = vpop.f32.mrf.mxu1 }
 0x119   : > { %v2370_v38 = vsel %vm1143_vm6, %v1035_v30, %v1175_v34  ;;  %v1038_v39 = vadd.f32 %v1730_v35, %v1618_v32  ;;  %v1620_v40 = vpop.f32.mrf.mxu0 }
 0x11a   : > { %v1621_v41 = vadd.f32 %v1620_v40, %v1619_v36  ;;  %v1732_v42 = vpop.f32.mrf.mxu1 }
 0x11b   : > { %vm1144_vm7 = vcmp.gt.f32.partialorder %v1038_v39, 0.0  ;;  %v1176_v43 = vmul.f32 0.01, %v1038_v39  ;;  %v1733_v44 = vadd.f32 %v1732_v42, %v1731_v37  ;;  %v1622_v45 = vpop.f32.mrf.mxu0 }
 0x11c   : > { %v1734_v46 = vpop.f32.mrf.mxu1 }
 0x11d   : > { %v2372_v47 = vsel %vm1144_vm7, %v1038_v39, %v1176_v43  ;;  %v1043_v49 = vadd.f32 %v1733_v44, %v1621_v41  ;;  %v1623_v50 = vpop.f32.mrf.mxu0 }
 0x11e   : > { %v1624_v51 = vadd.f32 %v1623_v50, %v1622_v45  ;;  %v1735_v52 = vpop.f32.mrf.mxu1 }
 0x11f   : > { %vm1145_vm8 = vcmp.gt.f32.partialorder %v1043_v49, 0.0  ;;  %v1177_v53 = vmul.f32 0.01, %v1043_v49  ;;  %v1736_v54 = vadd.f32 %v1735_v52, %v1734_v46  ;;  %v1625_v55 = vpop.f32.mrf.mxu0 }
 0x120   : > { %v1737_v56 = vpop.f32.mrf.mxu1 }
 0x121   : > { %v2374_v58 = vsel %vm1145_vm8, %v1043_v49, %v1177_v53  ;;  %v1046_v59 = vadd.f32 %v1736_v54, %v1624_v51  ;;  %v1626_v60 = vpop.f32.mrf.mxu0 }
 0x122   : > { %v1627_v61 = vadd.f32 %v1626_v60, %v1625_v55  ;;  %v1738_v62 = vpop.f32.mrf.mxu1 }
 0x123   : > { %vm1146_vm9 = vcmp.gt.f32.partialorder %v1046_v59, 0.0  ;;  %v1178_v63 = vmul.f32 0.01, %v1046_v59  ;;  %v1739_v0 = vadd.f32 %v1738_v62, %v1737_v56  ;;  %v1628_v1 = vpop.f32.mrf.mxu0 }
 0x124   : > { %v1740_v3 = vpop.f32.mrf.mxu1 }
 0x125   : > { %v2376_v4 = vsel %vm1146_vm9, %v1046_v59, %v1178_v63  ;;  %v1051_v5 = vadd.f32 %v1739_v0, %v1627_v61  ;;  %v1629_v6 = vpop.f32.mrf.mxu0 }
 0x126   : > { %v1630_v7 = vadd.f32 %v1629_v6, %v1628_v1  ;;  %v1741_v8 = vpop.f32.mrf.mxu1 }
 0x127   : > { %vm1147_vm10 = vcmp.gt.f32.partialorder %v1051_v5, 0.0  ;;  %v1179_v9 = vmul.f32 0.01, %v1051_v5  ;;  %v1742_v10 = vadd.f32 %v1741_v8, %v1740_v3  ;;  %v1631_v12 = vpop.f32.mrf.mxu0 }
 0x128   : > { %v1743_v13 = vpop.f32.mrf.mxu1 }
 0x129   : > { %v2378_v14 = vsel %vm1147_vm10, %v1051_v5, %v1179_v9  ;;  %v1054_v15 = vadd.f32 %v1742_v10, %v1630_v7  ;;  %v1632_v16 = vpop.f32.mrf.mxu0 }
 0x12a   : > { %v1633_v17 = vadd.f32 %v1632_v16, %v1631_v12  ;;  %v1744_v18 = vpop.f32.mrf.mxu1 }
 0x12b   : > { %vm1148_vm11 = vcmp.gt.f32.partialorder %v1054_v15, 0.0  ;;  %v1180_v19 = vmul.f32 0.01, %v1054_v15  ;;  %v1745_v21 = vadd.f32 %v1744_v18, %v1743_v13  ;;  %v1634_v22 = vpop.f32.mrf.mxu0 }
 0x12c   : > { %v1746_v23 = vpop.f32.mrf.mxu1 }
 0x12d   : > { %v2380_v24 = vsel %vm1148_vm11, %v1054_v15, %v1180_v19  ;;  %v1059_v25 = vadd.f32 %v1745_v21, %v1633_v17  ;;  %v1635_v26 = vpop.f32.mrf.mxu0 }
 0x12e   : > { %v1636_v27 = vadd.f32 %v1635_v26, %v1634_v22  ;;  %v1747_v28 = vpop.f32.mrf.mxu1 }
 0x12f   : > { %vm1149_vm12 = vcmp.gt.f32.partialorder %v1059_v25, 0.0  ;;  %v1181_v30 = vmul.f32 0.01, %v1059_v25  ;;  %v1748_v31 = vadd.f32 %v1747_v28, %v1746_v23  ;;  %v1637_v32 = vpop.f32.mrf.mxu0 }
 0x130   : > { %v1749_v33 = vpop.f32.mrf.mxu1 }
 0x131   : > { %v2382_v34 = vsel %vm1149_vm12, %v1059_v25, %v1181_v30  ;;  %v1062_v35 = vadd.f32 %v1748_v31, %v1636_v27  ;;  %v1638_v36 = vpop.f32.mrf.mxu0 }
 0x132   : > { %v1639_v37 = vadd.f32 %v1638_v36, %v1637_v32  ;;  %v1750_v39 = vpop.f32.mrf.mxu1 }
 0x133   : > { %vm1150_vm13 = vcmp.gt.f32.partialorder %v1062_v35, 0.0  ;;  %v1182_v40 = vmul.f32 0.01, %v1062_v35  ;;  %v1751_v41 = vadd.f32 %v1750_v39, %v1749_v33  ;;  %v1640_v42 = vpop.f32.mrf.mxu0 }
 0x134   : > { %v1752_v43 = vpop.f32.mrf.mxu1 }
 0x135   : > { %v2384_v44 = vsel %vm1150_vm13, %v1062_v35, %v1182_v40  ;;  %v1067_v45 = vadd.f32 %v1751_v41, %v1639_v37  ;;  %v1641_v46 = vpop.f32.mrf.mxu0 }
 0x136   : > { %v1642_v49 = vadd.f32 %v1641_v46, %v1640_v42  ;;  %v1753_v50 = vpop.f32.mrf.mxu1 }
 0x137   : > { %vm1151_vm14 = vcmp.gt.f32.partialorder %v1067_v45, 0.0  ;;  %v1183_v51 = vmul.f32 0.01, %v1067_v45  ;;  %v1754_v52 = vadd.f32 %v1753_v50, %v1752_v43  ;;  %v1643_v53 = vpop.f32.mrf.mxu0 }
 0x138   : > { %v1755_v54 = vpop.f32.mrf.mxu1 }
 0x139   : > { %v2386_v55 = vsel %vm1151_vm14, %v1067_v45, %v1183_v51  ;;  %v1070_v56 = vadd.f32 %v1754_v52, %v1642_v49  ;;  %v1644_v59 = vpop.f32.mrf.mxu0 }
 0x13a   : > { %v1645_v60 = vadd.f32 %v1644_v59, %v1643_v53  ;;  %v1756_v61 = vpop.f32.mrf.mxu1 }
 0x13b   : > { %vm1152_vm15 = vcmp.gt.f32.partialorder %v1070_v56, 0.0  ;;  %v1184_v62 = vmul.f32 0.01, %v1070_v56  ;;  %v1757_v63 = vadd.f32 %v1756_v61, %v1755_v54  ;;  %v1646_v0 = vpop.f32.mrf.mxu0 }
 0x13c   : > { %v1758_v1 = vpop.f32.mrf.mxu1 }
 0x13d   : > { %v2388_v3 = vsel %vm1152_vm15, %v1070_v56, %v1184_v62  ;;  %v1075_v5 = vadd.f32 %v1757_v63, %v1645_v60  ;;  %v1647_v6 = vpop.f32.mrf.mxu0 }
 0x13e   : > { %v1648_v7 = vadd.f32 %v1647_v6, %v1646_v0  ;;  %v1759_v8 = vpop.f32.mrf.mxu1 }
 0x13f   : > { %vm1153_vm0 = vcmp.gt.f32.partialorder %v1075_v5, 0.0  ;;  %v1185_v9 = vmul.f32 0.01, %v1075_v5  ;;  %v1760_v10 = vadd.f32 %v1759_v8, %v1758_v1  ;;  %v1649_v12 = vpop.f32.mrf.mxu0 }
 0x140   : > { %v1761_v13 = vpop.f32.mrf.mxu1 }
 0x141   : > { %v2390_v15 = vsel %vm1153_vm0, %v1075_v5, %v1185_v9  ;;  %v1078_v16 = vadd.f32 %v1760_v10, %v1648_v7  ;;  %v1650_v17 = vpop.f32.mrf.mxu0 }
 0x142   : > { %v1651_v18 = vadd.f32 %v1650_v17, %v1649_v12  ;;  %v1762_v19 = vpop.f32.mrf.mxu1 }
 0x143   : > { %vm1154_vm1 = vcmp.gt.f32.partialorder %v1078_v16, 0.0  ;;  %v1186_v21 = vmul.f32 0.01, %v1078_v16  ;;  %v1763_v22 = vadd.f32 %v1762_v19, %v1761_v13  ;;  %v1652_v23 = vpop.f32.mrf.mxu0 }
 0x144   : > { %v1764_v25 = vpop.f32.mrf.mxu1 }
 0x145   : > { %v2392_v26 = vsel %vm1154_vm1, %v1078_v16, %v1186_v21  ;;  %v1083_v27 = vadd.f32 %v1763_v22, %v1651_v18  ;;  %v1653_v28 = vpop.f32.mrf.mxu0 }
 0x146   : > { %v1654_v30 = vadd.f32 %v1653_v28, %v1652_v23  ;;  %v1765_v31 = vpop.f32.mrf.mxu1 }
 0x147   : > { %vm1155_vm2 = vcmp.gt.f32.partialorder %v1083_v27, 0.0  ;;  %v1187_v32 = vmul.f32 0.01, %v1083_v27  ;;  %v1766_v33 = vadd.f32 %v1765_v31, %v1764_v25  ;;  %v1655_v35 = vpop.f32.mrf.mxu0 }
 0x148   : > { %v1767_v36 = vpop.f32.mrf.mxu1 }
 0x149   : > { %v2394_v37 = vsel %vm1155_vm2, %v1083_v27, %v1187_v32  ;;  %v1086_v39 = vadd.f32 %v1766_v33, %v1654_v30  ;;  %v1656_v40 = vpop.f32.mrf.mxu0 }
 0x14a   : > { %v1657_v41 = vadd.f32 %v1656_v40, %v1655_v35  ;;  %v1768_v42 = vpop.f32.mrf.mxu1 }
 0x14b   : > { %vm1156_vm3 = vcmp.gt.f32.partialorder %v1086_v39, 0.0  ;;  %v1188_v43 = vmul.f32 0.01, %v1086_v39  ;;  %v1769_v45 = vadd.f32 %v1768_v42, %v1767_v36  ;;  %v1658_v46 = vpop.f32.mrf.mxu0 }
 0x14c   : > { %v1770_v49 = vpop.f32.mrf.mxu1 }
 0x14d   : > { %v2396_v50 = vsel %vm1156_vm3, %v1086_v39, %v1188_v43  ;;  %v1091_v51 = vadd.f32 %v1769_v45, %v1657_v41  ;;  %v1659_v52 = vpop.f32.mrf.mxu0 }
 0x14e   : > { %v1660_v53 = vadd.f32 %v1659_v52, %v1658_v46  ;;  %v1771_v54 = vpop.f32.mrf.mxu1 }
 0x14f   : > { %vm1157_vm4 = vcmp.gt.f32.partialorder %v1091_v51, 0.0  ;;  %v1189_v56 = vmul.f32 0.01, %v1091_v51  ;;  %v1772_v59 = vadd.f32 %v1771_v54, %v1770_v49  ;;  %v1661_v60 = vpop.f32.mrf.mxu0 }
 0x150   : > { %v1773_v61 = vpop.f32.mrf.mxu1 }
 0x151   : > { %v2398_v62 = vsel %vm1157_vm4, %v1091_v51, %v1189_v56  ;;  %v1094_v63 = vadd.f32 %v1772_v59, %v1660_v53  ;;  %v1662_v0 = vpop.f32.mrf.mxu0 }
 0x152   : > { %v1663_v1 = vadd.f32 %v1662_v0, %v1661_v60  ;;  %v1774_v5 = vpop.f32.mrf.mxu1 }
 0x153   : > { %vm1158_vm5 = vcmp.gt.f32.partialorder %v1094_v63, 0.0  ;;  %v1190_v6 = vmul.f32 0.01, %v1094_v63  ;;  %v1775_v7 = vadd.f32 %v1774_v5, %v1773_v61  ;;  %v1664_v8 = vpop.f32.mrf.mxu0 }
 0x154   : > { %v1776_v9 = vpop.f32.mrf.mxu1 }
 0x155   : > { %v2400_v10 = vsel %vm1158_vm5, %v1094_v63, %v1190_v6  ;;  %v1099_v12 = vadd.f32 %v1775_v7, %v1663_v1  ;;  %v1665_v13 = vpop.f32.mrf.mxu0 }
 0x156   : > { %v1666_v16 = vadd.f32 %v1665_v13, %v1664_v8  ;;  %v1777_v17 = vpop.f32.mrf.mxu1 }
 0x157   : > { %vm1159_vm6 = vcmp.gt.f32.partialorder %v1099_v12, 0.0  ;;  %v1191_v18 = vmul.f32 0.01, %v1099_v12  ;;  %v1778_v19 = vadd.f32 %v1777_v17, %v1776_v9  ;;  %v1667_v21 = vpop.f32.mrf.mxu0 }
 0x158   : > { %v1779_v22 = vpop.f32.mrf.mxu1 }
 0x159   : > { %v2402_v23 = vsel %vm1159_vm6, %v1099_v12, %v1191_v18  ;;  %v1102_v25 = vadd.f32 %v1778_v19, %v1666_v16  ;;  %v1668_v27 = vpop.f32.mrf.mxu0 }
 0x15a   : > { %v1669_v28 = vadd.f32 %v1668_v27, %v1667_v21  ;;  %v1780_v30 = vpop.f32.mrf.mxu1 }
 0x15b   : > { %vm1160_vm7 = vcmp.gt.f32.partialorder %v1102_v25, 0.0  ;;  %v1192_v31 = vmul.f32 0.01, %v1102_v25  ;;  %v1781_v32 = vadd.f32 %v1780_v30, %v1779_v22  ;;  %v1670_v33 = vpop.f32.mrf.mxu0 }
 0x15c   : > { %v1782_v35 = vpop.f32.mrf.mxu1 }
 0x15d   : > { %v2404_v36 = vsel %vm1160_vm7, %v1102_v25, %v1192_v31  ;;  %v1107_v39 = vadd.f32 %v1781_v32, %v1669_v28  ;;  %v1671_v40 = vpop.f32.mrf.mxu0 }
 0x15e   : > { %v1672_v41 = vadd.f32 %v1671_v40, %v1670_v33  ;;  %v1783_v42 = vpop.f32.mrf.mxu1 }
 0x15f   : > { %vm1161_vm8 = vcmp.gt.f32.partialorder %v1107_v39, 0.0  ;;  %v1193_v43 = vmul.f32 0.01, %v1107_v39  ;;  %v1784_v45 = vadd.f32 %v1783_v42, %v1782_v35  ;;  %v1673_v46 = vpop.f32.mrf.mxu0 }
 0x160   : > { %v1785_v49 = vpop.f32.mrf.mxu1 }
 0x161   : > { %v2406_v51 = vsel %vm1161_vm8, %v1107_v39, %v1193_v43  ;;  %v1110_v52 = vadd.f32 %v1784_v45, %v1672_v41  ;;  %v1674_v53 = vpop.f32.mrf.mxu0 }
 0x162   : > { %v1675_v54 = vadd.f32 %v1674_v53, %v1673_v46  ;;  %v1786_v56 = vpop.f32.mrf.mxu1 }
 0x163   : > { %vm1162_vm9 = vcmp.gt.f32.partialorder %v1110_v52, 0.0  ;;  %v1194_v59 = vmul.f32 0.01, %v1110_v52  ;;  %v1787_v60 = vadd.f32 %v1786_v56, %v1785_v49  ;;  %v1676_v61 = vpop.f32.mrf.mxu0 }
 0x164   : > { %v1788_v63 = vpop.f32.mrf.mxu1 }
 0x165   : > { %v2408_v0 = vsel %vm1162_vm9, %v1110_v52, %v1194_v59  ;;  %v1115_v1 = vadd.f32 %v1787_v60, %v1675_v54  ;;  %v1677_v5 = vpop.f32.mrf.mxu0 }
 0x166   : > { %v1678_v6 = vadd.f32 %v1677_v5, %v1676_v61  ;;  %v1789_v7 = vpop.f32.mrf.mxu1 }
 0x167   : > { %vm1163_vm10 = vcmp.gt.f32.partialorder %v1115_v1, 0.0  ;;  %v1195_v8 = vmul.f32 0.01, %v1115_v1  ;;  %v1790_v9 = vadd.f32 %v1789_v7, %v1788_v63  ;;  %v1679_v12 = vpop.f32.mrf.mxu0 }
 0x168   : > { %v1791_v13 = vpop.f32.mrf.mxu1 }
 0x169   : > { %v2410_v16 = vsel %vm1163_vm10, %v1115_v1, %v1195_v8  ;;  %v1118_v17 = vadd.f32 %v1790_v9, %v1678_v6  ;;  %v1680_v18 = vpop.f32.mrf.mxu0 }
 0x16a   : > { %v1681_v19 = vadd.f32 %v1680_v18, %v1679_v12  ;;  %v1792_v21 = vpop.f32.mrf.mxu1 }
 0x16b   : > { %vm1164_vm11 = vcmp.gt.f32.partialorder %v1118_v17, 0.0  ;;  %v1196_v22 = vmul.f32 0.01, %v1118_v17  ;;  %v1793_v25 = vadd.f32 %v1792_v21, %v1791_v13  ;;  %v1682_v27 = vpop.f32.mrf.mxu0 }
 0x16c   : > { %v1794_v28 = vpop.f32.mrf.mxu1 }
 0x16d   : > { %v2412_v30 = vsel %vm1164_vm11, %v1118_v17, %v1196_v22  ;;  %v1123_v31 = vadd.f32 %v1793_v25, %v1681_v19  ;;  %v1683_v32 = vpop.f32.mrf.mxu0 }
 0x16e   : > { %v1684_v33 = vadd.f32 %v1683_v32, %v1682_v27  ;;  %v1795_v35 = vpop.f32.mrf.mxu1 }
 0x16f   : > { %vm1165_vm12 = vcmp.gt.f32.partialorder %v1123_v31, 0.0  ;;  %v1197_v39 = vmul.f32 0.01, %v1123_v31  ;;  %v1796_v40 = vadd.f32 %v1795_v35, %v1794_v28  ;;  %v1685_v41 = vpop.f32.mrf.mxu0 }
 0x170   : > { %v1797_v42 = vpop.f32.mrf.mxu1 }
 0x171   : > { %v2414_v43 = vsel %vm1165_vm12, %v1123_v31, %v1197_v39  ;;  %v1126_v45 = vadd.f32 %v1796_v40, %v1684_v33  ;;  %v1686_v46 = vpop.f32.mrf.mxu0 }
 0x172   : > { %v1687_v49 = vadd.f32 %v1686_v46, %v1685_v41  ;;  %v1798_v52 = vpop.f32.mrf.mxu1 }
 0x173   : > { %vm1166_vm13 = vcmp.gt.f32.partialorder %v1126_v45, 0.0  ;;  %v1198_v53 = vmul.f32 0.01, %v1126_v45  ;;  %v1799_v54 = vadd.f32 %v1798_v52, %v1797_v42  ;;  %v1688_v56 = vpop.f32.mrf.mxu0 }
 0x174   : > { %v1800_v59 = vpop.f32.mrf.mxu1 }
 0x175   : > { %v2416_v60 = vsel %vm1166_vm13, %v1126_v45, %v1198_v53  ;;  %v1131_v61 = vadd.f32 %v1799_v54, %v1687_v49  ;;  %v1689_v63 = vpop.f32.mrf.mxu0 }
 0x176   : > { %v1690_v1 = vadd.f32 %v1689_v63, %v1688_v56  ;;  %v1801_v5 = vpop.f32.mrf.mxu1 }
 0x177   : > { %vm1167_vm14 = vcmp.gt.f32.partialorder %v1131_v61, 0.0  ;;  %v1199_v6 = vmul.f32 0.01, %v1131_v61  ;;  %v1802_v7 = vadd.f32 %v1801_v5, %v1800_v59 }
 0x179   : > { %v2418_v8 = vsel %vm1167_vm14, %v1131_v61, %v1199_v6  ;;  %v1134_v9 = vadd.f32 %v1802_v7, %v1690_v1  ;;  %1236 = sbr.rel (%p1571_p0) target bundleno = 398 (0x18e), region = 32 }
 0x17b   : > { %vm1168_vm15 = vcmp.gt.f32.partialorder %v1134_v9, 0.0  ;;  %v1200_v12 = vmul.f32 0.01, %v1134_v9 }
 0x17d   : > { %v2420_v13 = vsel %vm1168_vm15, %v1134_v9, %v1200_v12 }
 0x17e   : > { %1237 = vst [vmem:[%s2423_s24] sm:$0xff] %v2358_v48  ;;  %1238 = vst [vmem:[%s2423_s24 + $0x8] sm:$0xff] %v2360_v57 }
 0x17f   : > { %1239 = vst [vmem:[%s2423_s24 + $0x10] sm:$0xff] %v2362_v2  ;;  %1240 = vst [vmem:[%s2423_s24 + $0x18] sm:$0xff] %v2364_v11 }
 0x180   : > { %1241 = vst [vmem:[%s2423_s24 + $0x20] sm:$0xff] %v2366_v20  ;;  %1242 = vst [vmem:[%s2423_s24 + $0x28] sm:$0xff] %v2368_v29 }
 0x181   : > { %1243 = vst [vmem:[%s2423_s24 + $0x30] sm:$0xff] %v2370_v38  ;;  %1244 = vst [vmem:[%s2423_s24 + $0x38] sm:$0xff] %v2372_v47 }
 0x182   : > { %1245 = vst [vmem:[%s2423_s24 + $0x40] sm:$0xff] %v2374_v58  ;;  %1246 = vst [vmem:[%s2423_s24 + $0x48] sm:$0xff] %v2376_v4 }
 0x183   : > { %1247 = vst [vmem:[%s2423_s24 + $0x50] sm:$0xff] %v2378_v14  ;;  %1248 = vst [vmem:[%s2423_s24 + $0x58] sm:$0xff] %v2380_v24 }
 0x184   : > { %1249 = vst [vmem:[%s2423_s24 + $0x60] sm:$0xff] %v2382_v34  ;;  %1250 = vst [vmem:[%s2423_s24 + $0x68] sm:$0xff] %v2384_v44 }
 0x185   : > { %1251 = vst [vmem:[%s2423_s24 + $0x70] sm:$0xff] %v2386_v55  ;;  %1252 = vst [vmem:[%s2423_s24 + $0x78] sm:$0xff] %v2388_v3 }
 0x186   : > { %1253 = vst [vmem:[%s2423_s24 + $0x80] sm:$0xff] %v2390_v15  ;;  %1254 = vst [vmem:[%s2423_s24 + $0x88] sm:$0xff] %v2392_v26 }
 0x187   : > { %1255 = vst [vmem:[%s2423_s24 + $0x90] sm:$0xff] %v2394_v37  ;;  %1256 = vst [vmem:[%s2423_s24 + $0x98] sm:$0xff] %v2396_v50 }
 0x188   : > { %1257 = vst [vmem:[%s2423_s24 + $0xa0] sm:$0xff] %v2398_v62  ;;  %1258 = vst [vmem:[%s2423_s24 + $0xa8] sm:$0xff] %v2400_v10 }
 0x189   : > { %1259 = vst [vmem:[%s2423_s24 + $0xb0] sm:$0xff] %v2402_v23  ;;  %1260 = vst [vmem:[%s2423_s24 + $0xb8] sm:$0xff] %v2404_v36 }
 0x18a   : > { %1261 = vst [vmem:[%s2423_s24 + $0xc0] sm:$0xff] %v2406_v51  ;;  %1262 = vst [vmem:[%s2423_s24 + $0xc8] sm:$0xff] %v2408_v0 }
 0x18b   : > { %1263 = vst [vmem:[%s2423_s24 + $0xd0] sm:$0xff] %v2410_v16  ;;  %1264 = vst [vmem:[%s2423_s24 + $0xd8] sm:$0xff] %v2412_v30 }
 0x18c   : > { %1265 = vst [vmem:[%s2423_s24 + $0xe0] sm:$0xff] %v2414_v43  ;;  %1266 = vst [vmem:[%s2423_s24 + $0xe8] sm:$0xff] %v2416_v60 }
 0x18d   : > { %1267 = vst [vmem:[%s2423_s24 + $0xf0] sm:$0xff] %v2418_v8  ;;  %1268 = vst [vmem:[%s2423_s24 + $0xf8] sm:$0xff] %v2420_v13 }
 0x18e PF: > { %p1572_p1 = scmp.eq.s32.totalorder %s2080_s12, 0 }
 0x190   : > { %1272 = sbr.rel (%p1572_p1) target bundleno = 424 (0x1a8), region = 36 }
 0x195   : > { %v1273_v17 = vld [vmem:[%s2423_s24] sm:$0xff]  ;;  %v1274_v18 = vld [vmem:[%s2423_s24 + $0x8] sm:$0xff]  ;;  %v1275_v19 = vld [vmem:[%s2423_s24 + $0x10] sm:$0xff] }
 0x196   : > { %v1305_v21 = vadd.f32 %v1273_v17, %v2358_v48  ;;  %v1306_v22 = vadd.f32 %v1274_v18, %v2360_v57  ;;  %v1307_v25 = vadd.f32 %v1275_v19, %v2362_v2  ;;  %v1276_v27 = vld [vmem:[%s2423_s24 + $0x18] sm:$0xff]  ;;  %v1277_v28 = vld [vmem:[%s2423_s24 + $0x20] sm:$0xff]  ;;  %v1278_v31 = vld [vmem:[%s2423_s24 + $0x28] sm:$0xff] }
 0x197   : > { %v1308_v32 = vadd.f32 %v1276_v27, %v2364_v11  ;;  %v1309_v33 = vadd.f32 %v1277_v28, %v2366_v20  ;;  %v1310_v35 = vadd.f32 %v1278_v31, %v2368_v29  ;;  %v1279_v48 = vld [vmem:[%s2423_s24 + $0x30] sm:$0xff]  ;;  %v1280_v39 = vld [vmem:[%s2423_s24 + $0x38] sm:$0xff]  ;;  %v1281_v57 = vld [vmem:[%s2423_s24 + $0x40] sm:$0xff] }
 0x198   : > { %1337 = vst [vmem:[%s2423_s24] sm:$0xff] %v1305_v21  ;;  %1338 = vst [vmem:[%s2423_s24 + $0x8] sm:$0xff] %v1306_v22  ;;  %v1311_v2 = vadd.f32 %v1279_v48, %v2370_v38  ;;  %v1312_v11 = vadd.f32 %v1280_v39, %v2372_v47  ;;  %v1313_v20 = vadd.f32 %v1281_v57, %v2374_v58  ;;  %v1282_v40 = vld [vmem:[%s2423_s24 + $0x48] sm:$0xff]  ;;  %v1283_v29 = vld [vmem:[%s2423_s24 + $0x50] sm:$0xff] }
 0x199   : > { %1339 = vst [vmem:[%s2423_s24 + $0x10] sm:$0xff] %v1307_v25  ;;  %v1284_v41 = vld [vmem:[%s2423_s24 + $0x58] sm:$0xff]  ;;  %1340 = vst [vmem:[%s2423_s24 + $0x18] sm:$0xff] %v1308_v32  ;;  %v1314_v42 = vadd.f32 %v1282_v40, %v2376_v4  ;;  %v1315_v38 = vadd.f32 %v1283_v29, %v2378_v14  ;;  %v1285_v45 = vld [vmem:[%s2423_s24 + $0x60] sm:$0xff] }
 0x19a   : > { %1341 = vst [vmem:[%s2423_s24 + $0x20] sm:$0xff] %v1309_v33  ;;  %1342 = vst [vmem:[%s2423_s24 + $0x28] sm:$0xff] %v1310_v35  ;;  %v1316_v47 = vadd.f32 %v1284_v41, %v2380_v24  ;;  %v1286_v58 = vld [vmem:[%s2423_s24 + $0x68] sm:$0xff]  ;;  %v1287_v46 = vld [vmem:[%s2423_s24 + $0x70] sm:$0xff]  ;;  %v1317_v49 = vadd.f32 %v1285_v45, %v2382_v34 }
 0x19b   : > { %1343 = vst [vmem:[%s2423_s24 + $0x30] sm:$0xff] %v1311_v2  ;;  %1344 = vst [vmem:[%s2423_s24 + $0x38] sm:$0xff] %v1312_v11  ;;  %v1318_v4 = vadd.f32 %v1286_v58, %v2384_v44  ;;  %v1319_v14 = vadd.f32 %v1287_v46, %v2386_v55  ;;  %v1288_v52 = vld [vmem:[%s2423_s24 + $0x78] sm:$0xff]  ;;  %v1289_v24 = vld [vmem:[%s2423_s24 + $0x80] sm:$0xff] }
 0x19c   : > { %1345 = vst [vmem:[%s2423_s24 + $0x40] sm:$0xff] %v1313_v20  ;;  %v1290_v53 = vld [vmem:[%s2423_s24 + $0x88] sm:$0xff]  ;;  %1346 = vst [vmem:[%s2423_s24 + $0x48] sm:$0xff] %v1314_v42  ;;  %v1320_v54 = vadd.f32 %v1288_v52, %v2388_v3  ;;  %v1321_v34 = vadd.f32 %v1289_v24, %v2390_v15  ;;  %v1291_v56 = vld [vmem:[%s2423_s24 + $0x90] sm:$0xff] }
 0x19d   : > { %1347 = vst [vmem:[%s2423_s24 + $0x50] sm:$0xff] %v1315_v38  ;;  %1348 = vst [vmem:[%s2423_s24 + $0x58] sm:$0xff] %v1316_v47  ;;  %v1322_v44 = vadd.f32 %v1290_v53, %v2392_v26  ;;  %v1292_v55 = vld [vmem:[%s2423_s24 + $0x98] sm:$0xff]  ;;  %v1293_v59 = vld [vmem:[%s2423_s24 + $0xa0] sm:$0xff]  ;;  %v1323_v61 = vadd.f32 %v1291_v56, %v2394_v37 }
 0x19e   : > { %1349 = vst [vmem:[%s2423_s24 + $0x60] sm:$0xff] %v1317_v49  ;;  %1350 = vst [vmem:[%s2423_s24 + $0x68] sm:$0xff] %v1318_v4  ;;  %v1324_v3 = vadd.f32 %v1292_v55, %v2396_v50  ;;  %v1325_v15 = vadd.f32 %v1293_v59, %v2398_v62  ;;  %v1294_v63 = vld [vmem:[%s2423_s24 + $0xa8] sm:$0xff]  ;;  %v1295_v26 = vld [vmem:[%s2423_s24 + $0xb0] sm:$0xff] }
 0x19f   : > { %1351 = vst [vmem:[%s2423_s24 + $0x70] sm:$0xff] %v1319_v14  ;;  %v1296_v1 = vld [vmem:[%s2423_s24 + $0xb8] sm:$0xff]  ;;  %1352 = vst [vmem:[%s2423_s24 + $0x78] sm:$0xff] %v1320_v54  ;;  %v1326_v5 = vadd.f32 %v1294_v63, %v2400_v10  ;;  %v1327_v37 = vadd.f32 %v1295_v26, %v2402_v23  ;;  %v1297_v6 = vld [vmem:[%s2423_s24 + $0xc0] sm:$0xff] }
 0x1a0   : > { %1353 = vst [vmem:[%s2423_s24 + $0x80] sm:$0xff] %v1321_v34  ;;  %1354 = vst [vmem:[%s2423_s24 + $0x88] sm:$0xff] %v1322_v44  ;;  %v1328_v50 = vadd.f32 %v1296_v1, %v2404_v36  ;;  %v1298_v62 = vld [vmem:[%s2423_s24 + $0xc8] sm:$0xff]  ;;  %v1299_v7 = vld [vmem:[%s2423_s24 + $0xd0] sm:$0xff]  ;;  %v1329_v9 = vadd.f32 %v1297_v6, %v2406_v51 }
 0x1a1   : > { %1355 = vst [vmem:[%s2423_s24 + $0x90] sm:$0xff] %v1323_v61  ;;  %1356 = vst [vmem:[%s2423_s24 + $0x98] sm:$0xff] %v1324_v3  ;;  %v1330_v10 = vadd.f32 %v1298_v62, %v2408_v0  ;;  %v1331_v23 = vadd.f32 %v1299_v7, %v2410_v16  ;;  %v1300_v12 = vld [vmem:[%s2423_s24 + $0xd8] sm:$0xff]  ;;  %v1301_v36 = vld [vmem:[%s2423_s24 + $0xe0] sm:$0xff] }
 0x1a2   : > { %1357 = vst [vmem:[%s2423_s24 + $0xa0] sm:$0xff] %v1325_v15  ;;  %v1302_v17 = vld [vmem:[%s2423_s24 + $0xe8] sm:$0xff]  ;;  %1358 = vst [vmem:[%s2423_s24 + $0xa8] sm:$0xff] %v1326_v5  ;;  %v1332_v18 = vadd.f32 %v1300_v12, %v2412_v30  ;;  %v1333_v51 = vadd.f32 %v1301_v36, %v2414_v43  ;;  %v1303_v0 = vld [vmem:[%s2423_s24 + $0xf0] sm:$0xff] }
 0x1a3   : > { %1359 = vst [vmem:[%s2423_s24 + $0xb0] sm:$0xff] %v1327_v37  ;;  %1360 = vst [vmem:[%s2423_s24 + $0xb8] sm:$0xff] %v1328_v50  ;;  %v1334_v19 = vadd.f32 %v1302_v17, %v2416_v60  ;;  %v1304_v21 = vld [vmem:[%s2423_s24 + $0xf8] sm:$0xff]  ;;  %v1335_v16 = vadd.f32 %v1303_v0, %v2418_v8 }
 0x1a4   : > { %1361 = vst [vmem:[%s2423_s24 + $0xc0] sm:$0xff] %v1329_v9  ;;  %1362 = vst [vmem:[%s2423_s24 + $0xc8] sm:$0xff] %v1330_v10  ;;  %v1336_v22 = vadd.f32 %v1304_v21, %v2420_v13 }
 0x1a5   : > { %1363 = vst [vmem:[%s2423_s24 + $0xd0] sm:$0xff] %v1331_v23  ;;  %1364 = vst [vmem:[%s2423_s24 + $0xd8] sm:$0xff] %v1332_v18 }
 0x1a6   : > { %1365 = vst [vmem:[%s2423_s24 + $0xe0] sm:$0xff] %v1333_v51  ;;  %1366 = vst [vmem:[%s2423_s24 + $0xe8] sm:$0xff] %v1334_v19 }
 0x1a7   : > { %1367 = vst [vmem:[%s2423_s24 + $0xf0] sm:$0xff] %v1335_v16  ;;  %1368 = vst [vmem:[%s2423_s24 + $0xf8] sm:$0xff] %v1336_v22 }
 0x1a8 PF: > { %s1578_s12 = sshll.u32 %s2084_s13, 12  ;;  %s1383_s17 = sshll.u32 %s2423_s24, 4  ;;  %s2594_s17 = int_to_ptr.vmem [resolvable:$true] %s1383_s17 }
 0x1a9   : > { %s2591_s4 = scalar_lea.hbm %s2651_s2, %s1578_s12  ;;  %s2598_s30 = scalar_lea.sflag [#allocation3], %s159_s26 }
 0x1aa   : > { %s2004_s3 = scalar_lea.vmem %s2594_s17, 4096  ;;  %s2098_s13 = smov [#allocation2]  }
 0x1ab   : > { %p2005_p2 = scmp.ne.s32.totalorder %s2594_s17, %s2004_s3  ;;  %s2008_s5 = sshll.u32 %s2098_s13, 4  ;;  %s2009_s5 = int_to_ptr.vmem [resolvable:$false] %s2008_s5 }
 0x1ac   : > { %s2010_s7 = scalar_lea.vmem %s2009_s5, 8192  ;;  %p2011_p6 = scmp.lt.s32.totalorder %s2594_s17, %s2009_s5 }
 0x1ad   : > { %p2006_p4 = pnand %p2005_p2, %p2165_p3  ;;  %p2012_p7 = scmp.lt.s32.totalorder %s2010_s7, %s2004_s3 }
 0x1af   : > { %p2007_p5 = pneg %p2006_p4  ;;  %p2013_p8 = por %p2012_p7, %p2011_p6 }
 0x1b1   : > { %p2014_p10 = pnand %p2013_p8, %p2007_p5 }
 0x1b3   : > { %2017 = shalt.err (!%p2014_p10)
}
 0x1b4   : > { %s2018_s26 = scalar_lea.hbm %s2591_s4, 4096  ;;  %s2022_s18 = scalar_lea.hbm %s2651_s2, 8192 }
 0x1b5   : > { %p2019_p11 = scmp.ne.s32.totalorder %s2591_s4, %s2018_s26  ;;  %p2023_p0 = scmp.lt.s32.totalorder %s2591_s4, %s2651_s2 }
 0x1b6   : > { %p2024_p1 = scmp.lt.s32.totalorder %s2022_s18, %s2018_s26 }
 0x1b7   : > { %p2020_p12 = pnand %p2019_p11, %p2165_p3 }
 0x1b8   : > { %p2025_p2 = por %p2024_p1, %p2023_p0 }
 0x1b9   : > { %p2021_p13 = pneg %p2020_p12 }
 0x1bb   : > { %p2026_p4 = pnand %p2025_p2, %p2021_p13 }
 0x1bd   : > { %2029 = shalt.err (!%p2026_p4)
}
 0x1be   : > { %s2099_s24 = smov 128   ;;  %s2100_s12 = smov 8  }
 0x1bf   : > { %1803 = dma.vmem_to_hbm [thread:$0]  (%p2165_p3), %s2594_s17, 4096, %s2591_s4, %s2598_s30, %s2099_s24, %s2099_s24, %s2100_s12  }
 0x1c0 PF: > { %p1809_p5 = scmp.ge.s32.totalorder %s2096_s16, 2  ;;  %s1398_s29 = sand.u32 1, %s2068_s9  }
 0x1c1   : > { %s1399_s28 = scalar_lea.sflag [#allocation3], %s1398_s29 }
 0x1c2   : > { %p1806_p6 = pnand %p1809_p5, %p2175_p9 }
 0x1c4   : > { %p1807_p7 = pneg %p1806_p6 }
 0x1c6   : > { %2063 = dma.done.wait (%p1807_p7), %s1399_s28, 4096  }
 0x1c7   : > { %2065 = vsyncadd (%p1807_p7), %s1399_s28, 4294963200  ;;  %s15_s16 = sadd.s32 1, %s2096_s16   ;;  %s2654_s9 = smov %s2072_s10 }
 0x1c8   : > { %p12_p8 = scmp.ge.s32.totalorder %s15_s16, 8   ;;  %s2655_s10 = smov %s2076_s11 }
 0x1c9   : > { %s2656_s11 = smov %s2183_s25  ;;  %s2657_s12 = smov %s2088_s14 }
 0x1ca   : > { %s2658_s13 = smov %s2092_s15  ;;  %s2659_s14 = smov %s2662_s19 }
 0x1cb   : > { %s2660_s15 = smov %s2666_s20  ;;  %14 = sbr.rel (!%p12_p8) target bundleno = 5 (0x5), region = 71 }
 0x1d0   :  { %1404 = vsyncpa [#allocation3], 1 }
 0x1d1   :  { %1406 = vsyncpa [#allocation3 + $0x1], 1 }

</bundles_post_ra>
